<compile_context>
chip_gen: v7x
topology: tpu7x:2x2x1
jax: 0.10.0
libtpu: 0.0.40
codegen_flags: <defaults>
</compile_context>

<pallas_src>
import functools

import jax
import jax.numpy as jnp
import numpy as np
from jax import lax
from jax.experimental import pallas as pl
from jax.experimental.pallas import tpu as pltpu


# ----------------------------------------------------------------------------
# Fused kernel: all LSTM layers + Linear(H -> 1) for ONE batch element
# ----------------------------------------------------------------------------
def _fused_decoder_kernel(*refs, num_layers, hidden):
    """refs layout (per grid step = one batch element):
       refs[0]                      : x_ref      (1, T, Din)   this batch element
       refs[1 + 3*l + 0]            : w_ih_t     (Din_l, 4H)
       refs[1 + 3*l + 1]            : w_hh_t     (H, 4H)
       refs[1 + 3*l + 2]            : bias       (1, 4H)       (= b_ih + b_hh)
       refs[1 + 3*num_layers + 0]   : lin_w      (1, H)
       refs[1 + 3*num_layers + 1]   : lin_b      (1, 1)
       refs[-1]                     : out_ref    (1, 1, T)
    """
    H = hidden
    x_ref = refs[0]
    layer_refs = refs[1:1 + 3 * num_layers]
    lin_w_ref = refs[1 + 3 * num_layers]
    lin_b_ref = refs[2 + 3 * num_layers]
    out_ref = refs[3 + 3 * num_layers]

    x = x_ref[0].astype(jnp.float32)          # (T, Din) for this batch element
    T = x.shape[0]

    for layer in range(num_layers):
        w_ih_t = layer_refs[3 * layer][...]       # (Din, 4H)
        w_hh_t = layer_refs[3 * layer + 1][...]   # (H, 4H)
        bias = layer_refs[3 * layer + 2][...]     # (1, 4H)

        # Hoisted input projection: ONE matmul per layer, out of the recurrence.
        gates_x = jnp.dot(x, w_ih_t, preferred_element_type=jnp.float32) + bias  # (T, 4H)

        h = jnp.zeros((1, H), jnp.float32)
        c = jnp.zeros((1, H), jnp.float32)
        hs = []
        # Static unroll over time (T is a compile-time constant).
        for t in range(T):
            gates = gates_x[t:t + 1, :] + jnp.dot(
                h, w_hh_t, preferred_element_type=jnp.float32)   # (1, 4H)
            # Activate the full packed gate register once per nonlinearity,
            # slice the activated values (PyTorch gate order [i, f, g, o]).
            sig = jax.nn.sigmoid(gates)
            tah = jnp.tanh(gates)
            i_g = sig[:, 0:H]
            f_g = sig[:, H:2 * H]
            g_g = tah[:, 2 * H:3 * H]
            o_g = sig[:, 3 * H:4 * H]
            c = f_g * c + i_g * g_g
            h = o_g * jnp.tanh(c)
            hs.append(h)
        # Layer output stays on-chip; feeds the next layer / the final linear.
        x = jnp.concatenate(hs, axis=0)           # (T, H)

    # Final Linear(H -> 1), inline, lane-dense (1, T) result (T on the lane axis).
    w = lin_w_ref[...]                            # (1, H)
    out = lax.dot_general(w, x, (((1,), (1,)), ((), ())),
                          preferred_element_type=jnp.float32)    # (1, T)
    out_ref[0] = out + lin_b_ref[...]             # (1,1) broadcasts over T


# ----------------------------------------------------------------------------
# Wrapper
# ----------------------------------------------------------------------------
@functools.partial(jax.jit, static_argnames=("num_layers",))
def decoder_lstm_forward(x, lstm_params, lin_w, lin_b, *, num_layers):
    """x: (B, T, H_in) float32  ->  (B, T) float32."""
    B, T, Din0 = x.shape
    H = lstm_params[0][1].shape[1]                # w_hh: (4H, H)
    assert lin_w.shape[0] == 1, "output_size must be 1 for the .view(B, T)"

    inputs = [x.astype(jnp.float32)]
    in_specs = [pl.BlockSpec((1, T, Din0), lambda b: (b, 0, 0))]
    for (w_ih, w_hh, b_ih, b_hh) in lstm_params:
        for arr in (w_ih.T, w_hh.T, (b_ih + b_hh)[None, :]):
            arr = arr.astype(jnp.float32)
            inputs.append(arr)
            in_specs.append(pl.BlockSpec(arr.shape, lambda b: (0, 0)))
    inputs.append(lin_w.astype(jnp.float32))                  # (1, H)
    in_specs.append(pl.BlockSpec(lin_w.shape, lambda b: (0, 0)))
    inputs.append(lin_b.reshape(1, 1).astype(jnp.float32))    # (1, 1)
    in_specs.append(pl.BlockSpec((1, 1), lambda b: (0, 0)))

    kernel = functools.partial(_fused_decoder_kernel,
                               num_layers=num_layers, hidden=H)

    out = pl.pallas_call(
        kernel,
        out_shape=jax.ShapeDtypeStruct((B, 1, T), jnp.float32),
        grid=(B,),                                 # batch grid axis -> megacore on v7x
        in_specs=in_specs,
        out_specs=pl.BlockSpec((1, 1, T), lambda b: (b, 0, 0)),
        compiler_params=pltpu.CompilerParams(
            dimension_semantics=("parallel",)),
    )(*inputs)
    return out.reshape(B, T)                       # free reshape, no transpose


# ----------------------------------------------------------------------------
# Deterministic parameter construction (PyTorch-style uniform init)
# ----------------------------------------------------------------------------
def init_params(key, output_size, hidden_size, window_size):
    H0, H1 = hidden_size[0], hidden_size[1]
    k_lstm = 1.0 / np.sqrt(H0)
    lstm_params = []
    for layer in range(window_size):
        din = H1 if layer == 0 else H0
        key, k1, k2, k3, k4 = jax.random.split(key, 5)
        w_ih = jax.random.uniform(k1, (4 * H0, din), jnp.float32, -k_lstm, k_lstm)
        w_hh = jax.random.uniform(k2, (4 * H0, H0), jnp.float32, -k_lstm, k_lstm)
        b_ih = jax.random.uniform(k3, (4 * H0,), jnp.float32, -k_lstm, k_lstm)
        b_hh = jax.random.uniform(k4, (4 * H0,), jnp.float32, -k_lstm, k_lstm)
        lstm_params.append((w_ih, w_hh, b_ih, b_hh))
    key, k1, k2 = jax.random.split(key, 3)
    k_lin = 1.0 / np.sqrt(H0)
    lin_w = jax.random.uniform(k1, (output_size, H0), jnp.float32, -k_lin, k_lin)
    lin_b = jax.random.uniform(k2, (output_size,), jnp.float32, -k_lin, k_lin)
    return lstm_params, lin_w, lin_b


# ----------------------------------------------------------------------------
# Pure-JAX reference (same math, no Pallas) for a correctness check
# ----------------------------------------------------------------------------
def reference_forward(x, lstm_params, lin_w, lin_b):
    B, T, _ = x.shape
    seq = x.astype(jnp.float32)
    for (w_ih, w_hh, b_ih, b_hh) in lstm_params:
        H = w_hh.shape[1]
        h = jnp.zeros((B, H), jnp.float32)
        c = jnp.zeros((B, H), jnp.float32)
        outs = []
        for t in range(T):
            gates = seq[:, t, :] @ w_ih.T + h @ w_hh.T + b_ih + b_hh
            i = jax.nn.sigmoid(gates[:, 0:H])
            f = jax.nn.sigmoid(gates[:, H:2 * H])
            g = jnp.tanh(gates[:, 2 * H:3 * H])
            o = jax.nn.sigmoid(gates[:, 3 * H:4 * H])
            c = f * c + i * g
            h = o * jnp.tanh(c)
            outs.append(h)
        seq = jnp.stack(outs, axis=1)  # (B, T, H)
    out = seq @ lin_w.T + lin_b        # (B, T, 1)
    return out.reshape(B, T)


if __name__ == "__main__":
    # Module hyperparameters (output_size must be 1 for the .view(B, T)).
    output_size = 1
    hidden_size = (32, 32)   # (lstm hidden H0, lstm input H1)
    window_size = 3          # num_layers
    dropout_rate = 0.1       # defined but unused in forward()
    bidirectional = False
    assert not bidirectional, "bidirectional=True unsupported (see TODO above)"

    B, T = 2, 8

    key = jax.random.PRNGKey(0)
    key, pkey, xkey = jax.random.split(key, 3)
    lstm_params, lin_w, lin_b = init_params(pkey, output_size, hidden_size, window_size)
    x = jax.random.normal(xkey, (B, T, hidden_size[1]), jnp.float32)

    out = decoder_lstm_forward(
        x, tuple(lstm_params), lin_w, lin_b, num_layers=window_size
    )
    out = jax.block_until_ready(out)

    ref = reference_forward(x, lstm_params, lin_w, lin_b)
    np.testing.assert_allclose(np.asarray(out), np.asarray(ref), rtol=1e-5, atol=1e-5)
    assert out.shape == (B, T)

    print("KERNEL_OK")
</pallas_src>

<mosaic_0001>
module attributes {stable_mosaic.version = 11 : i64} {
  func.func @_fused_decoder_kernel(%arg0: i32, %arg1: memref<1x8x32xf32, #tpu.memory_space<vmem>>, %arg2: memref<32x128xf32, #tpu.memory_space<vmem>>, %arg3: memref<32x128xf32, #tpu.memory_space<vmem>>, %arg4: memref<1x128xf32, #tpu.memory_space<vmem>>, %arg5: memref<32x128xf32, #tpu.memory_space<vmem>>, %arg6: memref<32x128xf32, #tpu.memory_space<vmem>>, %arg7: memref<1x128xf32, #tpu.memory_space<vmem>>, %arg8: memref<32x128xf32, #tpu.memory_space<vmem>>, %arg9: memref<32x128xf32, #tpu.memory_space<vmem>>, %arg10: memref<1x128xf32, #tpu.memory_space<vmem>>, %arg11: memref<1x32xf32, #tpu.memory_space<vmem>>, %arg12: memref<1x1xf32, #tpu.memory_space<vmem>>, %arg13: memref<1x1x8xf32, #tpu.memory_space<vmem>>) attributes {dimension_semantics = [#tpu.dimension_semantics<parallel>], iteration_bounds = array<i64: 2>, scalar_prefetch = 0 : i64, scratch_operands = 0 : i64, tpu.core_type = #tpu.core_type<tc>, window_params = [{transform_indices = @transform_0, window_bounds = array<i64: 1, 8, 32>}, {pipeline_mode = #tpu.pipeline_mode<synchronous>, transform_indices = @transform_1, window_bounds = array<i64: 32, 128>}, {pipeline_mode = #tpu.pipeline_mode<synchronous>, transform_indices = @transform_2, window_bounds = array<i64: 32, 128>}, {pipeline_mode = #tpu.pipeline_mode<synchronous>, transform_indices = @transform_3, window_bounds = array<i64: 1, 128>}, {pipeline_mode = #tpu.pipeline_mode<synchronous>, transform_indices = @transform_4, window_bounds = array<i64: 32, 128>}, {pipeline_mode = #tpu.pipeline_mode<synchronous>, transform_indices = @transform_5, window_bounds = array<i64: 32, 128>}, {pipeline_mode = #tpu.pipeline_mode<synchronous>, transform_indices = @transform_6, window_bounds = array<i64: 1, 128>}, {pipeline_mode = #tpu.pipeline_mode<synchronous>, transform_indices = @transform_7, window_bounds = array<i64: 32, 128>}, {pipeline_mode = #tpu.pipeline_mode<synchronous>, transform_indices = @transform_8, window_bounds = array<i64: 32, 128>}, {pipeline_mode = #tpu.pipeline_mode<synchronous>, transform_indices = @transform_9, window_bounds = array<i64: 1, 128>}, {pipeline_mode = #tpu.pipeline_mode<synchronous>, transform_indices = @transform_10, window_bounds = array<i64: 1, 32>}, {pipeline_mode = #tpu.pipeline_mode<synchronous>, transform_indices = @transform_11, window_bounds = array<i64: 1, 1>}, {transform_indices = @transform_12, window_bounds = array<i64: 1, 1, 8>}]} {
    %c0 = arith.constant 0 : index
    %c0_0 = arith.constant 0 : index
    %c0_1 = arith.constant 0 : index
    %0 = vector.load %arg1[%c0, %c0_0, %c0_1] : memref<1x8x32xf32, #tpu.memory_space<vmem>>, vector<1x8x32xf32>
    %1 = vector.shape_cast %0 : vector<1x8x32xf32> to vector<8x32xf32>
    %c0_2 = arith.constant 0 : index
    %c0_3 = arith.constant 0 : index
    %2 = vector.load %arg2[%c0_2, %c0_3] : memref<32x128xf32, #tpu.memory_space<vmem>>, vector<32x128xf32>
    %c0_4 = arith.constant 0 : index
    %c0_5 = arith.constant 0 : index
    %3 = vector.load %arg3[%c0_4, %c0_5] : memref<32x128xf32, #tpu.memory_space<vmem>>, vector<32x128xf32>
    %c0_6 = arith.constant 0 : index
    %c0_7 = arith.constant 0 : index
    %4 = vector.load %arg4[%c0_6, %c0_7] : memref<1x128xf32, #tpu.memory_space<vmem>>, vector<1x128xf32>
    %cst = arith.constant dense<0.000000e+00> : vector<8x128xf32>
    %5 = tpu.matmul %1, %2, %cst {dimension_numbers = #tpu.dot_dimension_numbers<[1], [0], [0], [1], [0, 0, 1, 1], [], []>} : vector<8x32xf32>, vector<32x128xf32>, vector<8x128xf32> -> vector<8x128xf32>
    %6 = vector.broadcast %4 : vector<1x128xf32> to vector<8x128xf32>
    %7 = arith.addf %5, %6 : vector<8x128xf32>
    %cst_8 = arith.constant 0.000000e+00 : f32
    %8 = vector.broadcast %cst_8 : f32 to vector<1x32xf32>
    %cst_9 = arith.constant 0.000000e+00 : f32
    %9 = vector.broadcast %cst_9 : f32 to vector<1x32xf32>
    %10 = vector.extract_strided_slice %7 {offsets = [0, 0], sizes = [1, 128], strides = [1, 1]} : vector<8x128xf32> to vector<1x128xf32>
    %cst_10 = arith.constant dense<0.000000e+00> : vector<1x128xf32>
    %11 = tpu.matmul %8, %3, %cst_10 {dimension_numbers = #tpu.dot_dimension_numbers<[1], [0], [0], [1], [0, 0, 1, 1], [], []>} : vector<1x32xf32>, vector<32x128xf32>, vector<1x128xf32> -> vector<1x128xf32>
    %12 = arith.addf %10, %11 : vector<1x128xf32>
    %13 = arith.negf %12 : vector<1x128xf32>
    %14 = math.exp %13 : vector<1x128xf32>
    %cst_11 = arith.constant 1.000000e+00 : f32
    %15 = vector.broadcast %cst_11 : f32 to vector<1x128xf32>
    %16 = arith.addf %15, %14 : vector<1x128xf32>
    %17 = arith.divf %15, %16 : vector<1x128xf32>
    %18 = math.tanh %12 : vector<1x128xf32>
    %19 = vector.extract_strided_slice %17 {offsets = [0, 0], sizes = [1, 32], strides = [1, 1]} : vector<1x128xf32> to vector<1x32xf32>
    %20 = vector.extract_strided_slice %17 {offsets = [0, 32], sizes = [1, 32], strides = [1, 1]} : vector<1x128xf32> to vector<1x32xf32>
    %21 = vector.extract_strided_slice %18 {offsets = [0, 64], sizes = [1, 32], strides = [1, 1]} : vector<1x128xf32> to vector<1x32xf32>
    %22 = vector.extract_strided_slice %17 {offsets = [0, 96], sizes = [1, 32], strides = [1, 1]} : vector<1x128xf32> to vector<1x32xf32>
    %23 = arith.mulf %20, %9 : vector<1x32xf32>
    %24 = arith.mulf %19, %21 : vector<1x32xf32>
    %25 = arith.addf %23, %24 : vector<1x32xf32>
    %26 = math.tanh %25 : vector<1x32xf32>
    %27 = arith.mulf %22, %26 : vector<1x32xf32>
    %28 = vector.extract_strided_slice %7 {offsets = [1, 0], sizes = [1, 128], strides = [1, 1]} : vector<8x128xf32> to vector<1x128xf32>
    %cst_12 = arith.constant dense<0.000000e+00> : vector<1x128xf32>
    %29 = tpu.matmul %27, %3, %cst_12 {dimension_numbers = #tpu.dot_dimension_numbers<[1], [0], [0], [1], [0, 0, 1, 1], [], []>} : vector<1x32xf32>, vector<32x128xf32>, vector<1x128xf32> -> vector<1x128xf32>
    %30 = arith.addf %28, %29 : vector<1x128xf32>
    %31 = arith.negf %30 : vector<1x128xf32>
    %32 = math.exp %31 : vector<1x128xf32>
    %cst_13 = arith.constant 1.000000e+00 : f32
    %33 = vector.broadcast %cst_13 : f32 to vector<1x128xf32>
    %34 = arith.addf %33, %32 : vector<1x128xf32>
    %35 = arith.divf %33, %34 : vector<1x128xf32>
    %36 = math.tanh %30 : vector<1x128xf32>
    %37 = vector.extract_strided_slice %35 {offsets = [0, 0], sizes = [1, 32], strides = [1, 1]} : vector<1x128xf32> to vector<1x32xf32>
    %38 = vector.extract_strided_slice %35 {offsets = [0, 32], sizes = [1, 32], strides = [1, 1]} : vector<1x128xf32> to vector<1x32xf32>
    %39 = vector.extract_strided_slice %36 {offsets = [0, 64], sizes = [1, 32], strides = [1, 1]} : vector<1x128xf32> to vector<1x32xf32>
    %40 = vector.extract_strided_slice %35 {offsets = [0, 96], sizes = [1, 32], strides = [1, 1]} : vector<1x128xf32> to vector<1x32xf32>
    %41 = arith.mulf %38, %25 : vector<1x32xf32>
    %42 = arith.mulf %37, %39 : vector<1x32xf32>
    %43 = arith.addf %41, %42 : vector<1x32xf32>
    %44 = math.tanh %43 : vector<1x32xf32>
    %45 = arith.mulf %40, %44 : vector<1x32xf32>
    %46 = vector.extract_strided_slice %7 {offsets = [2, 0], sizes = [1, 128], strides = [1, 1]} : vector<8x128xf32> to vector<1x128xf32>
    %cst_14 = arith.constant dense<0.000000e+00> : vector<1x128xf32>
    %47 = tpu.matmul %45, %3, %cst_14 {dimension_numbers = #tpu.dot_dimension_numbers<[1], [0], [0], [1], [0, 0, 1, 1], [], []>} : vector<1x32xf32>, vector<32x128xf32>, vector<1x128xf32> -> vector<1x128xf32>
    %48 = arith.addf %46, %47 : vector<1x128xf32>
    %49 = arith.negf %48 : vector<1x128xf32>
    %50 = math.exp %49 : vector<1x128xf32>
    %cst_15 = arith.constant 1.000000e+00 : f32
    %51 = vector.broadcast %cst_15 : f32 to vector<1x128xf32>
    %52 = arith.addf %51, %50 : vector<1x128xf32>
    %53 = arith.divf %51, %52 : vector<1x128xf32>
    %54 = math.tanh %48 : vector<1x128xf32>
    %55 = vector.extract_strided_slice %53 {offsets = [0, 0], sizes = [1, 32], strides = [1, 1]} : vector<1x128xf32> to vector<1x32xf32>
    %56 = vector.extract_strided_slice %53 {offsets = [0, 32], sizes = [1, 32], strides = [1, 1]} : vector<1x128xf32> to vector<1x32xf32>
    %57 = vector.extract_strided_slice %54 {offsets = [0, 64], sizes = [1, 32], strides = [1, 1]} : vector<1x128xf32> to vector<1x32xf32>
    %58 = vector.extract_strided_slice %53 {offsets = [0, 96], sizes = [1, 32], strides = [1, 1]} : vector<1x128xf32> to vector<1x32xf32>
    %59 = arith.mulf %56, %43 : vector<1x32xf32>
    %60 = arith.mulf %55, %57 : vector<1x32xf32>
    %61 = arith.addf %59, %60 : vector<1x32xf32>
    %62 = math.tanh %61 : vector<1x32xf32>
    %63 = arith.mulf %58, %62 : vector<1x32xf32>
    %64 = vector.extract_strided_slice %7 {offsets = [3, 0], sizes = [1, 128], strides = [1, 1]} : vector<8x128xf32> to vector<1x128xf32>
    %cst_16 = arith.constant dense<0.000000e+00> : vector<1x128xf32>
    %65 = tpu.matmul %63, %3, %cst_16 {dimension_numbers = #tpu.dot_dimension_numbers<[1], [0], [0], [1], [0, 0, 1, 1], [], []>} : vector<1x32xf32>, vector<32x128xf32>, vector<1x128xf32> -> vector<1x128xf32>
    %66 = arith.addf %64, %65 : vector<1x128xf32>
    %67 = arith.negf %66 : vector<1x128xf32>
    %68 = math.exp %67 : vector<1x128xf32>
    %cst_17 = arith.constant 1.000000e+00 : f32
    %69 = vector.broadcast %cst_17 : f32 to vector<1x128xf32>
    %70 = arith.addf %69, %68 : vector<1x128xf32>
    %71 = arith.divf %69, %70 : vector<1x128xf32>
    %72 = math.tanh %66 : vector<1x128xf32>
    %73 = vector.extract_strided_slice %71 {offsets = [0, 0], sizes = [1, 32], strides = [1, 1]} : vector<1x128xf32> to vector<1x32xf32>
    %74 = vector.extract_strided_slice %71 {offsets = [0, 32], sizes = [1, 32], strides = [1, 1]} : vector<1x128xf32> to vector<1x32xf32>
    %75 = vector.extract_strided_slice %72 {offsets = [0, 64], sizes = [1, 32], strides = [1, 1]} : vector<1x128xf32> to vector<1x32xf32>
    %76 = vector.extract_strided_slice %71 {offsets = [0, 96], sizes = [1, 32], strides = [1, 1]} : vector<1x128xf32> to vector<1x32xf32>
    %77 = arith.mulf %74, %61 : vector<1x32xf32>
    %78 = arith.mulf %73, %75 : vector<1x32xf32>
    %79 = arith.addf %77, %78 : vector<1x32xf32>
    %80 = math.tanh %79 : vector<1x32xf32>
    %81 = arith.mulf %76, %80 : vector<1x32xf32>
    %82 = vector.extract_strided_slice %7 {offsets = [4, 0], sizes = [1, 128], strides = [1, 1]} : vector<8x128xf32> to vector<1x128xf32>
    %cst_18 = arith.constant dense<0.000000e+00> : vector<1x128xf32>
    %83 = tpu.matmul %81, %3, %cst_18 {dimension_numbers = #tpu.dot_dimension_numbers<[1], [0], [0], [1], [0, 0, 1, 1], [], []>} : vector<1x32xf32>, vector<32x128xf32>, vector<1x128xf32> -> vector<1x128xf32>
    %84 = arith.addf %82, %83 : vector<1x128xf32>
    %85 = arith.negf %84 : vector<1x128xf32>
    %86 = math.exp %85 : vector<1x128xf32>
    %cst_19 = arith.constant 1.000000e+00 : f32
    %87 = vector.broadcast %cst_19 : f32 to vector<1x128xf32>
    %88 = arith.addf %87, %86 : vector<1x128xf32>
    %89 = arith.divf %87, %88 : vector<1x128xf32>
    %90 = math.tanh %84 : vector<1x128xf32>
    %91 = vector.extract_strided_slice %89 {offsets = [0, 0], sizes = [1, 32], strides = [1, 1]} : vector<1x128xf32> to vector<1x32xf32>
    %92 = vector.extract_strided_slice %89 {offsets = [0, 32], sizes = [1, 32], strides = [1, 1]} : vector<1x128xf32> to vector<1x32xf32>
    %93 = vector.extract_strided_slice %90 {offsets = [0, 64], sizes = [1, 32], strides = [1, 1]} : vector<1x128xf32> to vector<1x32xf32>
    %94 = vector.extract_strided_slice %89 {offsets = [0, 96], sizes = [1, 32], strides = [1, 1]} : vector<1x128xf32> to vector<1x32xf32>
    %95 = arith.mulf %92, %79 : vector<1x32xf32>
    %96 = arith.mulf %91, %93 : vector<1x32xf32>
    %97 = arith.addf %95, %96 : vector<1x32xf32>
    %98 = math.tanh %97 : vector<1x32xf32>
    %99 = arith.mulf %94, %98 : vector<1x32xf32>
    %100 = vector.extract_strided_slice %7 {offsets = [5, 0], sizes = [1, 128], strides = [1, 1]} : vector<8x128xf32> to vector<1x128xf32>
    %cst_20 = arith.constant dense<0.000000e+00> : vector<1x128xf32>
    %101 = tpu.matmul %99, %3, %cst_20 {dimension_numbers = #tpu.dot_dimension_numbers<[1], [0], [0], [1], [0, 0, 1, 1], [], []>} : vector<1x32xf32>, vector<32x128xf32>, vector<1x128xf32> -> vector<1x128xf32>
    %102 = arith.addf %100, %101 : vector<1x128xf32>
    %103 = arith.negf %102 : vector<1x128xf32>
    %104 = math.exp %103 : vector<1x128xf32>
    %cst_21 = arith.constant 1.000000e+00 : f32
    %105 = vector.broadcast %cst_21 : f32 to vector<1x128xf32>
    %106 = arith.addf %105, %104 : vector<1x128xf32>
    %107 = arith.divf %105, %106 : vector<1x128xf32>
    %108 = math.tanh %102 : vector<1x128xf32>
    %109 = vector.extract_strided_slice %107 {offsets = [0, 0], sizes = [1, 32], strides = [1, 1]} : vector<1x128xf32> to vector<1x32xf32>
    %110 = vector.extract_strided_slice %107 {offsets = [0, 32], sizes = [1, 32], strides = [1, 1]} : vector<1x128xf32> to vector<1x32xf32>
    %111 = vector.extract_strided_slice %108 {offsets = [0, 64], sizes = [1, 32], strides = [1, 1]} : vector<1x128xf32> to vector<1x32xf32>
    %112 = vector.extract_strided_slice %107 {offsets = [0, 96], sizes = [1, 32], strides = [1, 1]} : vector<1x128xf32> to vector<1x32xf32>
    %113 = arith.mulf %110, %97 : vector<1x32xf32>
    %114 = arith.mulf %109, %111 : vector<1x32xf32>
    %115 = arith.addf %113, %114 : vector<1x32xf32>
    %116 = math.tanh %115 : vector<1x32xf32>
    %117 = arith.mulf %112, %116 : vector<1x32xf32>
    %118 = vector.extract_strided_slice %7 {offsets = [6, 0], sizes = [1, 128], strides = [1, 1]} : vector<8x128xf32> to vector<1x128xf32>
    %cst_22 = arith.constant dense<0.000000e+00> : vector<1x128xf32>
    %119 = tpu.matmul %117, %3, %cst_22 {dimension_numbers = #tpu.dot_dimension_numbers<[1], [0], [0], [1], [0, 0, 1, 1], [], []>} : vector<1x32xf32>, vector<32x128xf32>, vector<1x128xf32> -> vector<1x128xf32>
    %120 = arith.addf %118, %119 : vector<1x128xf32>
    %121 = arith.negf %120 : vector<1x128xf32>
    %122 = math.exp %121 : vector<1x128xf32>
    %cst_23 = arith.constant 1.000000e+00 : f32
    %123 = vector.broadcast %cst_23 : f32 to vector<1x128xf32>
    %124 = arith.addf %123, %122 : vector<1x128xf32>
    %125 = arith.divf %123, %124 : vector<1x128xf32>
    %126 = math.tanh %120 : vector<1x128xf32>
    %127 = vector.extract_strided_slice %125 {offsets = [0, 0], sizes = [1, 32], strides = [1, 1]} : vector<1x128xf32> to vector<1x32xf32>
    %128 = vector.extract_strided_slice %125 {offsets = [0, 32], sizes = [1, 32], strides = [1, 1]} : vector<1x128xf32> to vector<1x32xf32>
    %129 = vector.extract_strided_slice %126 {offsets = [0, 64], sizes = [1, 32], strides = [1, 1]} : vector<1x128xf32> to vector<1x32xf32>
    %130 = vector.extract_strided_slice %125 {offsets = [0, 96], sizes = [1, 32], strides = [1, 1]} : vector<1x128xf32> to vector<1x32xf32>
    %131 = arith.mulf %128, %115 : vector<1x32xf32>
    %132 = arith.mulf %127, %129 : vector<1x32xf32>
    %133 = arith.addf %131, %132 : vector<1x32xf32>
    %134 = math.tanh %133 : vector<1x32xf32>
    %135 = arith.mulf %130, %134 : vector<1x32xf32>
    %136 = vector.extract_strided_slice %7 {offsets = [7, 0], sizes = [1, 128], strides = [1, 1]} : vector<8x128xf32> to vector<1x128xf32>
    %cst_24 = arith.constant dense<0.000000e+00> : vector<1x128xf32>
    %137 = tpu.matmul %135, %3, %cst_24 {dimension_numbers = #tpu.dot_dimension_numbers<[1], [0], [0], [1], [0, 0, 1, 1], [], []>} : vector<1x32xf32>, vector<32x128xf32>, vector<1x128xf32> -> vector<1x128xf32>
    %138 = arith.addf %136, %137 : vector<1x128xf32>
    %139 = arith.negf %138 : vector<1x128xf32>
    %140 = math.exp %139 : vector<1x128xf32>
    %cst_25 = arith.constant 1.000000e+00 : f32
    %141 = vector.broadcast %cst_25 : f32 to vector<1x128xf32>
    %142 = arith.addf %141, %140 : vector<1x128xf32>
    %143 = arith.divf %141, %142 : vector<1x128xf32>
    %144 = math.tanh %138 : vector<1x128xf32>
    %145 = vector.extract_strided_slice %143 {offsets = [0, 0], sizes = [1, 32], strides = [1, 1]} : vector<1x128xf32> to vector<1x32xf32>
    %146 = vector.extract_strided_slice %143 {offsets = [0, 32], sizes = [1, 32], strides = [1, 1]} : vector<1x128xf32> to vector<1x32xf32>
    %147 = vector.extract_strided_slice %144 {offsets = [0, 64], sizes = [1, 32], strides = [1, 1]} : vector<1x128xf32> to vector<1x32xf32>
    %148 = vector.extract_strided_slice %143 {offsets = [0, 96], sizes = [1, 32], strides = [1, 1]} : vector<1x128xf32> to vector<1x32xf32>
    %149 = arith.mulf %146, %133 : vector<1x32xf32>
    %150 = arith.mulf %145, %147 : vector<1x32xf32>
    %151 = arith.addf %149, %150 : vector<1x32xf32>
    %152 = math.tanh %151 : vector<1x32xf32>
    %153 = arith.mulf %148, %152 : vector<1x32xf32>
    %154 = tpu.concatenate %27, %45, %63, %81, %99, %117, %135, %153 in 0 : vector<1x32xf32>, vector<1x32xf32>, vector<1x32xf32>, vector<1x32xf32>, vector<1x32xf32>, vector<1x32xf32>, vector<1x32xf32>, vector<1x32xf32> -> vector<8x32xf32>
    %c0_26 = arith.constant 0 : index
    %c0_27 = arith.constant 0 : index
    %155 = vector.load %arg5[%c0_26, %c0_27] : memref<32x128xf32, #tpu.memory_space<vmem>>, vector<32x128xf32>
    %c0_28 = arith.constant 0 : index
    %c0_29 = arith.constant 0 : index
    %156 = vector.load %arg6[%c0_28, %c0_29] : memref<32x128xf32, #tpu.memory_space<vmem>>, vector<32x128xf32>
    %c0_30 = arith.constant 0 : index
    %c0_31 = arith.constant 0 : index
    %157 = vector.load %arg7[%c0_30, %c0_31] : memref<1x128xf32, #tpu.memory_space<vmem>>, vector<1x128xf32>
    %cst_32 = arith.constant dense<0.000000e+00> : vector<8x128xf32>
    %158 = tpu.matmul %154, %155, %cst_32 {dimension_numbers = #tpu.dot_dimension_numbers<[1], [0], [0], [1], [0, 0, 1, 1], [], []>} : vector<8x32xf32>, vector<32x128xf32>, vector<8x128xf32> -> vector<8x128xf32>
    %159 = vector.broadcast %157 : vector<1x128xf32> to vector<8x128xf32>
    %160 = arith.addf %158, %159 : vector<8x128xf32>
    %cst_33 = arith.constant 0.000000e+00 : f32
    %161 = vector.broadcast %cst_33 : f32 to vector<1x32xf32>
    %cst_34 = arith.constant 0.000000e+00 : f32
    %162 = vector.broadcast %cst_34 : f32 to vector<1x32xf32>
    %163 = vector.extract_strided_slice %160 {offsets = [0, 0], sizes = [1, 128], strides = [1, 1]} : vector<8x128xf32> to vector<1x128xf32>
    %cst_35 = arith.constant dense<0.000000e+00> : vector<1x128xf32>
    %164 = tpu.matmul %161, %156, %cst_35 {dimension_numbers = #tpu.dot_dimension_numbers<[1], [0], [0], [1], [0, 0, 1, 1], [], []>} : vector<1x32xf32>, vector<32x128xf32>, vector<1x128xf32> -> vector<1x128xf32>
    %165 = arith.addf %163, %164 : vector<1x128xf32>
    %166 = arith.negf %165 : vector<1x128xf32>
    %167 = math.exp %166 : vector<1x128xf32>
    %cst_36 = arith.constant 1.000000e+00 : f32
    %168 = vector.broadcast %cst_36 : f32 to vector<1x128xf32>
    %169 = arith.addf %168, %167 : vector<1x128xf32>
    %170 = arith.divf %168, %169 : vector<1x128xf32>
    %171 = math.tanh %165 : vector<1x128xf32>
    %172 = vector.extract_strided_slice %170 {offsets = [0, 0], sizes = [1, 32], strides = [1, 1]} : vector<1x128xf32> to vector<1x32xf32>
    %173 = vector.extract_strided_slice %170 {offsets = [0, 32], sizes = [1, 32], strides = [1, 1]} : vector<1x128xf32> to vector<1x32xf32>
    %174 = vector.extract_strided_slice %171 {offsets = [0, 64], sizes = [1, 32], strides = [1, 1]} : vector<1x128xf32> to vector<1x32xf32>
    %175 = vector.extract_strided_slice %170 {offsets = [0, 96], sizes = [1, 32], strides = [1, 1]} : vector<1x128xf32> to vector<1x32xf32>
    %176 = arith.mulf %173, %162 : vector<1x32xf32>
    %177 = arith.mulf %172, %174 : vector<1x32xf32>
    %178 = arith.addf %176, %177 : vector<1x32xf32>
    %179 = math.tanh %178 : vector<1x32xf32>
    %180 = arith.mulf %175, %179 : vector<1x32xf32>
    %181 = vector.extract_strided_slice %160 {offsets = [1, 0], sizes = [1, 128], strides = [1, 1]} : vector<8x128xf32> to vector<1x128xf32>
    %cst_37 = arith.constant dense<0.000000e+00> : vector<1x128xf32>
    %182 = tpu.matmul %180, %156, %cst_37 {dimension_numbers = #tpu.dot_dimension_numbers<[1], [0], [0], [1], [0, 0, 1, 1], [], []>} : vector<1x32xf32>, vector<32x128xf32>, vector<1x128xf32> -> vector<1x128xf32>
    %183 = arith.addf %181, %182 : vector<1x128xf32>
    %184 = arith.negf %183 : vector<1x128xf32>
    %185 = math.exp %184 : vector<1x128xf32>
    %cst_38 = arith.constant 1.000000e+00 : f32
    %186 = vector.broadcast %cst_38 : f32 to vector<1x128xf32>
    %187 = arith.addf %186, %185 : vector<1x128xf32>
    %188 = arith.divf %186, %187 : vector<1x128xf32>
    %189 = math.tanh %183 : vector<1x128xf32>
    %190 = vector.extract_strided_slice %188 {offsets = [0, 0], sizes = [1, 32], strides = [1, 1]} : vector<1x128xf32> to vector<1x32xf32>
    %191 = vector.extract_strided_slice %188 {offsets = [0, 32], sizes = [1, 32], strides = [1, 1]} : vector<1x128xf32> to vector<1x32xf32>
    %192 = vector.extract_strided_slice %189 {offsets = [0, 64], sizes = [1, 32], strides = [1, 1]} : vector<1x128xf32> to vector<1x32xf32>
    %193 = vector.extract_strided_slice %188 {offsets = [0, 96], sizes = [1, 32], strides = [1, 1]} : vector<1x128xf32> to vector<1x32xf32>
    %194 = arith.mulf %191, %178 : vector<1x32xf32>
    %195 = arith.mulf %190, %192 : vector<1x32xf32>
    %196 = arith.addf %194, %195 : vector<1x32xf32>
    %197 = math.tanh %196 : vector<1x32xf32>
    %198 = arith.mulf %193, %197 : vector<1x32xf32>
    %199 = vector.extract_strided_slice %160 {offsets = [2, 0], sizes = [1, 128], strides = [1, 1]} : vector<8x128xf32> to vector<1x128xf32>
    %cst_39 = arith.constant dense<0.000000e+00> : vector<1x128xf32>
    %200 = tpu.matmul %198, %156, %cst_39 {dimension_numbers = #tpu.dot_dimension_numbers<[1], [0], [0], [1], [0, 0, 1, 1], [], []>} : vector<1x32xf32>, vector<32x128xf32>, vector<1x128xf32> -> vector<1x128xf32>
    %201 = arith.addf %199, %200 : vector<1x128xf32>
    %202 = arith.negf %201 : vector<1x128xf32>
    %203 = math.exp %202 : vector<1x128xf32>
    %cst_40 = arith.constant 1.000000e+00 : f32
    %204 = vector.broadcast %cst_40 : f32 to vector<1x128xf32>
    %205 = arith.addf %204, %203 : vector<1x128xf32>
    %206 = arith.divf %204, %205 : vector<1x128xf32>
    %207 = math.tanh %201 : vector<1x128xf32>
    %208 = vector.extract_strided_slice %206 {offsets = [0, 0], sizes = [1, 32], strides = [1, 1]} : vector<1x128xf32> to vector<1x32xf32>
    %209 = vector.extract_strided_slice %206 {offsets = [0, 32], sizes = [1, 32], strides = [1, 1]} : vector<1x128xf32> to vector<1x32xf32>
    %210 = vector.extract_strided_slice %207 {offsets = [0, 64], sizes = [1, 32], strides = [1, 1]} : vector<1x128xf32> to vector<1x32xf32>
    %211 = vector.extract_strided_slice %206 {offsets = [0, 96], sizes = [1, 32], strides = [1, 1]} : vector<1x128xf32> to vector<1x32xf32>
    %212 = arith.mulf %209, %196 : vector<1x32xf32>
    %213 = arith.mulf %208, %210 : vector<1x32xf32>
    %214 = arith.addf %212, %213 : vector<1x32xf32>
    %215 = math.tanh %214 : vector<1x32xf32>
    %216 = arith.mulf %211, %215 : vector<1x32xf32>
    %217 = vector.extract_strided_slice %160 {offsets = [3, 0], sizes = [1, 128], strides = [1, 1]} : vector<8x128xf32> to vector<1x128xf32>
    %cst_41 = arith.constant dense<0.000000e+00> : vector<1x128xf32>
    %218 = tpu.matmul %216, %156, %cst_41 {dimension_numbers = #tpu.dot_dimension_numbers<[1], [0], [0], [1], [0, 0, 1, 1], [], []>} : vector<1x32xf32>, vector<32x128xf32>, vector<1x128xf32> -> vector<1x128xf32>
    %219 = arith.addf %217, %218 : vector<1x128xf32>
    %220 = arith.negf %219 : vector<1x128xf32>
    %221 = math.exp %220 : vector<1x128xf32>
    %cst_42 = arith.constant 1.000000e+00 : f32
    %222 = vector.broadcast %cst_42 : f32 to vector<1x128xf32>
    %223 = arith.addf %222, %221 : vector<1x128xf32>
    %224 = arith.divf %222, %223 : vector<1x128xf32>
    %225 = math.tanh %219 : vector<1x128xf32>
    %226 = vector.extract_strided_slice %224 {offsets = [0, 0], sizes = [1, 32], strides = [1, 1]} : vector<1x128xf32> to vector<1x32xf32>
    %227 = vector.extract_strided_slice %224 {offsets = [0, 32], sizes = [1, 32], strides = [1, 1]} : vector<1x128xf32> to vector<1x32xf32>
    %228 = vector.extract_strided_slice %225 {offsets = [0, 64], sizes = [1, 32], strides = [1, 1]} : vector<1x128xf32> to vector<1x32xf32>
    %229 = vector.extract_strided_slice %224 {offsets = [0, 96], sizes = [1, 32], strides = [1, 1]} : vector<1x128xf32> to vector<1x32xf32>
    %230 = arith.mulf %227, %214 : vector<1x32xf32>
    %231 = arith.mulf %226, %228 : vector<1x32xf32>
    %232 = arith.addf %230, %231 : vector<1x32xf32>
    %233 = math.tanh %232 : vector<1x32xf32>
    %234 = arith.mulf %229, %233 : vector<1x32xf32>
    %235 = vector.extract_strided_slice %160 {offsets = [4, 0], sizes = [1, 128], strides = [1, 1]} : vector<8x128xf32> to vector<1x128xf32>
    %cst_43 = arith.constant dense<0.000000e+00> : vector<1x128xf32>
    %236 = tpu.matmul %234, %156, %cst_43 {dimension_numbers = #tpu.dot_dimension_numbers<[1], [0], [0], [1], [0, 0, 1, 1], [], []>} : vector<1x32xf32>, vector<32x128xf32>, vector<1x128xf32> -> vector<1x128xf32>
    %237 = arith.addf %235, %236 : vector<1x128xf32>
    %238 = arith.negf %237 : vector<1x128xf32>
    %239 = math.exp %238 : vector<1x128xf32>
    %cst_44 = arith.constant 1.000000e+00 : f32
    %240 = vector.broadcast %cst_44 : f32 to vector<1x128xf32>
    %241 = arith.addf %240, %239 : vector<1x128xf32>
    %242 = arith.divf %240, %241 : vector<1x128xf32>
    %243 = math.tanh %237 : vector<1x128xf32>
    %244 = vector.extract_strided_slice %242 {offsets = [0, 0], sizes = [1, 32], strides = [1, 1]} : vector<1x128xf32> to vector<1x32xf32>
    %245 = vector.extract_strided_slice %242 {offsets = [0, 32], sizes = [1, 32], strides = [1, 1]} : vector<1x128xf32> to vector<1x32xf32>
    %246 = vector.extract_strided_slice %243 {offsets = [0, 64], sizes = [1, 32], strides = [1, 1]} : vector<1x128xf32> to vector<1x32xf32>
    %247 = vector.extract_strided_slice %242 {offsets = [0, 96], sizes = [1, 32], strides = [1, 1]} : vector<1x128xf32> to vector<1x32xf32>
    %248 = arith.mulf %245, %232 : vector<1x32xf32>
    %249 = arith.mulf %244, %246 : vector<1x32xf32>
    %250 = arith.addf %248, %249 : vector<1x32xf32>
    %251 = math.tanh %250 : vector<1x32xf32>
    %252 = arith.mulf %247, %251 : vector<1x32xf32>
    %253 = vector.extract_strided_slice %160 {offsets = [5, 0], sizes = [1, 128], strides = [1, 1]} : vector<8x128xf32> to vector<1x128xf32>
    %cst_45 = arith.constant dense<0.000000e+00> : vector<1x128xf32>
    %254 = tpu.matmul %252, %156, %cst_45 {dimension_numbers = #tpu.dot_dimension_numbers<[1], [0], [0], [1], [0, 0, 1, 1], [], []>} : vector<1x32xf32>, vector<32x128xf32>, vector<1x128xf32> -> vector<1x128xf32>
    %255 = arith.addf %253, %254 : vector<1x128xf32>
    %256 = arith.negf %255 : vector<1x128xf32>
    %257 = math.exp %256 : vector<1x128xf32>
    %cst_46 = arith.constant 1.000000e+00 : f32
    %258 = vector.broadcast %cst_46 : f32 to vector<1x128xf32>
    %259 = arith.addf %258, %257 : vector<1x128xf32>
    %260 = arith.divf %258, %259 : vector<1x128xf32>
    %261 = math.tanh %255 : vector<1x128xf32>
    %262 = vector.extract_strided_slice %260 {offsets = [0, 0], sizes = [1, 32], strides = [1, 1]} : vector<1x128xf32> to vector<1x32xf32>
    %263 = vector.extract_strided_slice %260 {offsets = [0, 32], sizes = [1, 32], strides = [1, 1]} : vector<1x128xf32> to vector<1x32xf32>
    %264 = vector.extract_strided_slice %261 {offsets = [0, 64], sizes = [1, 32], strides = [1, 1]} : vector<1x128xf32> to vector<1x32xf32>
    %265 = vector.extract_strided_slice %260 {offsets = [0, 96], sizes = [1, 32], strides = [1, 1]} : vector<1x128xf32> to vector<1x32xf32>
    %266 = arith.mulf %263, %250 : vector<1x32xf32>
    %267 = arith.mulf %262, %264 : vector<1x32xf32>
    %268 = arith.addf %266, %267 : vector<1x32xf32>
    %269 = math.tanh %268 : vector<1x32xf32>
    %270 = arith.mulf %265, %269 : vector<1x32xf32>
    %271 = vector.extract_strided_slice %160 {offsets = [6, 0], sizes = [1, 128], strides = [1, 1]} : vector<8x128xf32> to vector<1x128xf32>
    %cst_47 = arith.constant dense<0.000000e+00> : vector<1x128xf32>
    %272 = tpu.matmul %270, %156, %cst_47 {dimension_numbers = #tpu.dot_dimension_numbers<[1], [0], [0], [1], [0, 0, 1, 1], [], []>} : vector<1x32xf32>, vector<32x128xf32>, vector<1x128xf32> -> vector<1x128xf32>
    %273 = arith.addf %271, %272 : vector<1x128xf32>
    %274 = arith.negf %273 : vector<1x128xf32>
    %275 = math.exp %274 : vector<1x128xf32>
    %cst_48 = arith.constant 1.000000e+00 : f32
    %276 = vector.broadcast %cst_48 : f32 to vector<1x128xf32>
    %277 = arith.addf %276, %275 : vector<1x128xf32>
    %278 = arith.divf %276, %277 : vector<1x128xf32>
    %279 = math.tanh %273 : vector<1x128xf32>
    %280 = vector.extract_strided_slice %278 {offsets = [0, 0], sizes = [1, 32], strides = [1, 1]} : vector<1x128xf32> to vector<1x32xf32>
    %281 = vector.extract_strided_slice %278 {offsets = [0, 32], sizes = [1, 32], strides = [1, 1]} : vector<1x128xf32> to vector<1x32xf32>
    %282 = vector.extract_strided_slice %279 {offsets = [0, 64], sizes = [1, 32], strides = [1, 1]} : vector<1x128xf32> to vector<1x32xf32>
    %283 = vector.extract_strided_slice %278 {offsets = [0, 96], sizes = [1, 32], strides = [1, 1]} : vector<1x128xf32> to vector<1x32xf32>
    %284 = arith.mulf %281, %268 : vector<1x32xf32>
    %285 = arith.mulf %280, %282 : vector<1x32xf32>
    %286 = arith.addf %284, %285 : vector<1x32xf32>
    %287 = math.tanh %286 : vector<1x32xf32>
    %288 = arith.mulf %283, %287 : vector<1x32xf32>
    %289 = vector.extract_strided_slice %160 {offsets = [7, 0], sizes = [1, 128], strides = [1, 1]} : vector<8x128xf32> to vector<1x128xf32>
    %cst_49 = arith.constant dense<0.000000e+00> : vector<1x128xf32>
    %290 = tpu.matmul %288, %156, %cst_49 {dimension_numbers = #tpu.dot_dimension_numbers<[1], [0], [0], [1], [0, 0, 1, 1], [], []>} : vector<1x32xf32>, vector<32x128xf32>, vector<1x128xf32> -> vector<1x128xf32>
    %291 = arith.addf %289, %290 : vector<1x128xf32>
    %292 = arith.negf %291 : vector<1x128xf32>
    %293 = math.exp %292 : vector<1x128xf32>
    %cst_50 = arith.constant 1.000000e+00 : f32
    %294 = vector.broadcast %cst_50 : f32 to vector<1x128xf32>
    %295 = arith.addf %294, %293 : vector<1x128xf32>
    %296 = arith.divf %294, %295 : vector<1x128xf32>
    %297 = math.tanh %291 : vector<1x128xf32>
    %298 = vector.extract_strided_slice %296 {offsets = [0, 0], sizes = [1, 32], strides = [1, 1]} : vector<1x128xf32> to vector<1x32xf32>
    %299 = vector.extract_strided_slice %296 {offsets = [0, 32], sizes = [1, 32], strides = [1, 1]} : vector<1x128xf32> to vector<1x32xf32>
    %300 = vector.extract_strided_slice %297 {offsets = [0, 64], sizes = [1, 32], strides = [1, 1]} : vector<1x128xf32> to vector<1x32xf32>
    %301 = vector.extract_strided_slice %296 {offsets = [0, 96], sizes = [1, 32], strides = [1, 1]} : vector<1x128xf32> to vector<1x32xf32>
    %302 = arith.mulf %299, %286 : vector<1x32xf32>
    %303 = arith.mulf %298, %300 : vector<1x32xf32>
    %304 = arith.addf %302, %303 : vector<1x32xf32>
    %305 = math.tanh %304 : vector<1x32xf32>
    %306 = arith.mulf %301, %305 : vector<1x32xf32>
    %307 = tpu.concatenate %180, %198, %216, %234, %252, %270, %288, %306 in 0 : vector<1x32xf32>, vector<1x32xf32>, vector<1x32xf32>, vector<1x32xf32>, vector<1x32xf32>, vector<1x32xf32>, vector<1x32xf32>, vector<1x32xf32> -> vector<8x32xf32>
    %c0_51 = arith.constant 0 : index
    %c0_52 = arith.constant 0 : index
    %308 = vector.load %arg8[%c0_51, %c0_52] : memref<32x128xf32, #tpu.memory_space<vmem>>, vector<32x128xf32>
    %c0_53 = arith.constant 0 : index
    %c0_54 = arith.constant 0 : index
    %309 = vector.load %arg9[%c0_53, %c0_54] : memref<32x128xf32, #tpu.memory_space<vmem>>, vector<32x128xf32>
    %c0_55 = arith.constant 0 : index
    %c0_56 = arith.constant 0 : index
    %310 = vector.load %arg10[%c0_55, %c0_56] : memref<1x128xf32, #tpu.memory_space<vmem>>, vector<1x128xf32>
    %cst_57 = arith.constant dense<0.000000e+00> : vector<8x128xf32>
    %311 = tpu.matmul %307, %308, %cst_57 {dimension_numbers = #tpu.dot_dimension_numbers<[1], [0], [0], [1], [0, 0, 1, 1], [], []>} : vector<8x32xf32>, vector<32x128xf32>, vector<8x128xf32> -> vector<8x128xf32>
    %312 = vector.broadcast %310 : vector<1x128xf32> to vector<8x128xf32>
    %313 = arith.addf %311, %312 : vector<8x128xf32>
    %cst_58 = arith.constant 0.000000e+00 : f32
    %314 = vector.broadcast %cst_58 : f32 to vector<1x32xf32>
    %cst_59 = arith.constant 0.000000e+00 : f32
    %315 = vector.broadcast %cst_59 : f32 to vector<1x32xf32>
    %316 = vector.extract_strided_slice %313 {offsets = [0, 0], sizes = [1, 128], strides = [1, 1]} : vector<8x128xf32> to vector<1x128xf32>
    %cst_60 = arith.constant dense<0.000000e+00> : vector<1x128xf32>
    %317 = tpu.matmul %314, %309, %cst_60 {dimension_numbers = #tpu.dot_dimension_numbers<[1], [0], [0], [1], [0, 0, 1, 1], [], []>} : vector<1x32xf32>, vector<32x128xf32>, vector<1x128xf32> -> vector<1x128xf32>
    %318 = arith.addf %316, %317 : vector<1x128xf32>
    %319 = arith.negf %318 : vector<1x128xf32>
    %320 = math.exp %319 : vector<1x128xf32>
    %cst_61 = arith.constant 1.000000e+00 : f32
    %321 = vector.broadcast %cst_61 : f32 to vector<1x128xf32>
    %322 = arith.addf %321, %320 : vector<1x128xf32>
    %323 = arith.divf %321, %322 : vector<1x128xf32>
    %324 = math.tanh %318 : vector<1x128xf32>
    %325 = vector.extract_strided_slice %323 {offsets = [0, 0], sizes = [1, 32], strides = [1, 1]} : vector<1x128xf32> to vector<1x32xf32>
    %326 = vector.extract_strided_slice %323 {offsets = [0, 32], sizes = [1, 32], strides = [1, 1]} : vector<1x128xf32> to vector<1x32xf32>
    %327 = vector.extract_strided_slice %324 {offsets = [0, 64], sizes = [1, 32], strides = [1, 1]} : vector<1x128xf32> to vector<1x32xf32>
    %328 = vector.extract_strided_slice %323 {offsets = [0, 96], sizes = [1, 32], strides = [1, 1]} : vector<1x128xf32> to vector<1x32xf32>
    %329 = arith.mulf %326, %315 : vector<1x32xf32>
    %330 = arith.mulf %325, %327 : vector<1x32xf32>
    %331 = arith.addf %329, %330 : vector<1x32xf32>
    %332 = math.tanh %331 : vector<1x32xf32>
    %333 = arith.mulf %328, %332 : vector<1x32xf32>
    %334 = vector.extract_strided_slice %313 {offsets = [1, 0], sizes = [1, 128], strides = [1, 1]} : vector<8x128xf32> to vector<1x128xf32>
    %cst_62 = arith.constant dense<0.000000e+00> : vector<1x128xf32>
    %335 = tpu.matmul %333, %309, %cst_62 {dimension_numbers = #tpu.dot_dimension_numbers<[1], [0], [0], [1], [0, 0, 1, 1], [], []>} : vector<1x32xf32>, vector<32x128xf32>, vector<1x128xf32> -> vector<1x128xf32>
    %336 = arith.addf %334, %335 : vector<1x128xf32>
    %337 = arith.negf %336 : vector<1x128xf32>
    %338 = math.exp %337 : vector<1x128xf32>
    %cst_63 = arith.constant 1.000000e+00 : f32
    %339 = vector.broadcast %cst_63 : f32 to vector<1x128xf32>
    %340 = arith.addf %339, %338 : vector<1x128xf32>
    %341 = arith.divf %339, %340 : vector<1x128xf32>
    %342 = math.tanh %336 : vector<1x128xf32>
    %343 = vector.extract_strided_slice %341 {offsets = [0, 0], sizes = [1, 32], strides = [1, 1]} : vector<1x128xf32> to vector<1x32xf32>
    %344 = vector.extract_strided_slice %341 {offsets = [0, 32], sizes = [1, 32], strides = [1, 1]} : vector<1x128xf32> to vector<1x32xf32>
    %345 = vector.extract_strided_slice %342 {offsets = [0, 64], sizes = [1, 32], strides = [1, 1]} : vector<1x128xf32> to vector<1x32xf32>
    %346 = vector.extract_strided_slice %341 {offsets = [0, 96], sizes = [1, 32], strides = [1, 1]} : vector<1x128xf32> to vector<1x32xf32>
    %347 = arith.mulf %344, %331 : vector<1x32xf32>
    %348 = arith.mulf %343, %345 : vector<1x32xf32>
    %349 = arith.addf %347, %348 : vector<1x32xf32>
    %350 = math.tanh %349 : vector<1x32xf32>
    %351 = arith.mulf %346, %350 : vector<1x32xf32>
    %352 = vector.extract_strided_slice %313 {offsets = [2, 0], sizes = [1, 128], strides = [1, 1]} : vector<8x128xf32> to vector<1x128xf32>
    %cst_64 = arith.constant dense<0.000000e+00> : vector<1x128xf32>
    %353 = tpu.matmul %351, %309, %cst_64 {dimension_numbers = #tpu.dot_dimension_numbers<[1], [0], [0], [1], [0, 0, 1, 1], [], []>} : vector<1x32xf32>, vector<32x128xf32>, vector<1x128xf32> -> vector<1x128xf32>
    %354 = arith.addf %352, %353 : vector<1x128xf32>
    %355 = arith.negf %354 : vector<1x128xf32>
    %356 = math.exp %355 : vector<1x128xf32>
    %cst_65 = arith.constant 1.000000e+00 : f32
    %357 = vector.broadcast %cst_65 : f32 to vector<1x128xf32>
    %358 = arith.addf %357, %356 : vector<1x128xf32>
    %359 = arith.divf %357, %358 : vector<1x128xf32>
    %360 = math.tanh %354 : vector<1x128xf32>
    %361 = vector.extract_strided_slice %359 {offsets = [0, 0], sizes = [1, 32], strides = [1, 1]} : vector<1x128xf32> to vector<1x32xf32>
    %362 = vector.extract_strided_slice %359 {offsets = [0, 32], sizes = [1, 32], strides = [1, 1]} : vector<1x128xf32> to vector<1x32xf32>
    %363 = vector.extract_strided_slice %360 {offsets = [0, 64], sizes = [1, 32], strides = [1, 1]} : vector<1x128xf32> to vector<1x32xf32>
    %364 = vector.extract_strided_slice %359 {offsets = [0, 96], sizes = [1, 32], strides = [1, 1]} : vector<1x128xf32> to vector<1x32xf32>
    %365 = arith.mulf %362, %349 : vector<1x32xf32>
    %366 = arith.mulf %361, %363 : vector<1x32xf32>
    %367 = arith.addf %365, %366 : vector<1x32xf32>
    %368 = math.tanh %367 : vector<1x32xf32>
    %369 = arith.mulf %364, %368 : vector<1x32xf32>
    %370 = vector.extract_strided_slice %313 {offsets = [3, 0], sizes = [1, 128], strides = [1, 1]} : vector<8x128xf32> to vector<1x128xf32>
    %cst_66 = arith.constant dense<0.000000e+00> : vector<1x128xf32>
    %371 = tpu.matmul %369, %309, %cst_66 {dimension_numbers = #tpu.dot_dimension_numbers<[1], [0], [0], [1], [0, 0, 1, 1], [], []>} : vector<1x32xf32>, vector<32x128xf32>, vector<1x128xf32> -> vector<1x128xf32>
    %372 = arith.addf %370, %371 : vector<1x128xf32>
    %373 = arith.negf %372 : vector<1x128xf32>
    %374 = math.exp %373 : vector<1x128xf32>
    %cst_67 = arith.constant 1.000000e+00 : f32
    %375 = vector.broadcast %cst_67 : f32 to vector<1x128xf32>
    %376 = arith.addf %375, %374 : vector<1x128xf32>
    %377 = arith.divf %375, %376 : vector<1x128xf32>
    %378 = math.tanh %372 : vector<1x128xf32>
    %379 = vector.extract_strided_slice %377 {offsets = [0, 0], sizes = [1, 32], strides = [1, 1]} : vector<1x128xf32> to vector<1x32xf32>
    %380 = vector.extract_strided_slice %377 {offsets = [0, 32], sizes = [1, 32], strides = [1, 1]} : vector<1x128xf32> to vector<1x32xf32>
    %381 = vector.extract_strided_slice %378 {offsets = [0, 64], sizes = [1, 32], strides = [1, 1]} : vector<1x128xf32> to vector<1x32xf32>
    %382 = vector.extract_strided_slice %377 {offsets = [0, 96], sizes = [1, 32], strides = [1, 1]} : vector<1x128xf32> to vector<1x32xf32>
    %383 = arith.mulf %380, %367 : vector<1x32xf32>
    %384 = arith.mulf %379, %381 : vector<1x32xf32>
    %385 = arith.addf %383, %384 : vector<1x32xf32>
    %386 = math.tanh %385 : vector<1x32xf32>
    %387 = arith.mulf %382, %386 : vector<1x32xf32>
    %388 = vector.extract_strided_slice %313 {offsets = [4, 0], sizes = [1, 128], strides = [1, 1]} : vector<8x128xf32> to vector<1x128xf32>
    %cst_68 = arith.constant dense<0.000000e+00> : vector<1x128xf32>
    %389 = tpu.matmul %387, %309, %cst_68 {dimension_numbers = #tpu.dot_dimension_numbers<[1], [0], [0], [1], [0, 0, 1, 1], [], []>} : vector<1x32xf32>, vector<32x128xf32>, vector<1x128xf32> -> vector<1x128xf32>
    %390 = arith.addf %388, %389 : vector<1x128xf32>
    %391 = arith.negf %390 : vector<1x128xf32>
    %392 = math.exp %391 : vector<1x128xf32>
    %cst_69 = arith.constant 1.000000e+00 : f32
    %393 = vector.broadcast %cst_69 : f32 to vector<1x128xf32>
    %394 = arith.addf %393, %392 : vector<1x128xf32>
    %395 = arith.divf %393, %394 : vector<1x128xf32>
    %396 = math.tanh %390 : vector<1x128xf32>
    %397 = vector.extract_strided_slice %395 {offsets = [0, 0], sizes = [1, 32], strides = [1, 1]} : vector<1x128xf32> to vector<1x32xf32>
    %398 = vector.extract_strided_slice %395 {offsets = [0, 32], sizes = [1, 32], strides = [1, 1]} : vector<1x128xf32> to vector<1x32xf32>
    %399 = vector.extract_strided_slice %396 {offsets = [0, 64], sizes = [1, 32], strides = [1, 1]} : vector<1x128xf32> to vector<1x32xf32>
    %400 = vector.extract_strided_slice %395 {offsets = [0, 96], sizes = [1, 32], strides = [1, 1]} : vector<1x128xf32> to vector<1x32xf32>
    %401 = arith.mulf %398, %385 : vector<1x32xf32>
    %402 = arith.mulf %397, %399 : vector<1x32xf32>
    %403 = arith.addf %401, %402 : vector<1x32xf32>
    %404 = math.tanh %403 : vector<1x32xf32>
    %405 = arith.mulf %400, %404 : vector<1x32xf32>
    %406 = vector.extract_strided_slice %313 {offsets = [5, 0], sizes = [1, 128], strides = [1, 1]} : vector<8x128xf32> to vector<1x128xf32>
    %cst_70 = arith.constant dense<0.000000e+00> : vector<1x128xf32>
    %407 = tpu.matmul %405, %309, %cst_70 {dimension_numbers = #tpu.dot_dimension_numbers<[1], [0], [0], [1], [0, 0, 1, 1], [], []>} : vector<1x32xf32>, vector<32x128xf32>, vector<1x128xf32> -> vector<1x128xf32>
    %408 = arith.addf %406, %407 : vector<1x128xf32>
    %409 = arith.negf %408 : vector<1x128xf32>
    %410 = math.exp %409 : vector<1x128xf32>
    %cst_71 = arith.constant 1.000000e+00 : f32
    %411 = vector.broadcast %cst_71 : f32 to vector<1x128xf32>
    %412 = arith.addf %411, %410 : vector<1x128xf32>
    %413 = arith.divf %411, %412 : vector<1x128xf32>
    %414 = math.tanh %408 : vector<1x128xf32>
    %415 = vector.extract_strided_slice %413 {offsets = [0, 0], sizes = [1, 32], strides = [1, 1]} : vector<1x128xf32> to vector<1x32xf32>
    %416 = vector.extract_strided_slice %413 {offsets = [0, 32], sizes = [1, 32], strides = [1, 1]} : vector<1x128xf32> to vector<1x32xf32>
    %417 = vector.extract_strided_slice %414 {offsets = [0, 64], sizes = [1, 32], strides = [1, 1]} : vector<1x128xf32> to vector<1x32xf32>
    %418 = vector.extract_strided_slice %413 {offsets = [0, 96], sizes = [1, 32], strides = [1, 1]} : vector<1x128xf32> to vector<1x32xf32>
    %419 = arith.mulf %416, %403 : vector<1x32xf32>
    %420 = arith.mulf %415, %417 : vector<1x32xf32>
    %421 = arith.addf %419, %420 : vector<1x32xf32>
    %422 = math.tanh %421 : vector<1x32xf32>
    %423 = arith.mulf %418, %422 : vector<1x32xf32>
    %424 = vector.extract_strided_slice %313 {offsets = [6, 0], sizes = [1, 128], strides = [1, 1]} : vector<8x128xf32> to vector<1x128xf32>
    %cst_72 = arith.constant dense<0.000000e+00> : vector<1x128xf32>
    %425 = tpu.matmul %423, %309, %cst_72 {dimension_numbers = #tpu.dot_dimension_numbers<[1], [0], [0], [1], [0, 0, 1, 1], [], []>} : vector<1x32xf32>, vector<32x128xf32>, vector<1x128xf32> -> vector<1x128xf32>
    %426 = arith.addf %424, %425 : vector<1x128xf32>
    %427 = arith.negf %426 : vector<1x128xf32>
    %428 = math.exp %427 : vector<1x128xf32>
    %cst_73 = arith.constant 1.000000e+00 : f32
    %429 = vector.broadcast %cst_73 : f32 to vector<1x128xf32>
    %430 = arith.addf %429, %428 : vector<1x128xf32>
    %431 = arith.divf %429, %430 : vector<1x128xf32>
    %432 = math.tanh %426 : vector<1x128xf32>
    %433 = vector.extract_strided_slice %431 {offsets = [0, 0], sizes = [1, 32], strides = [1, 1]} : vector<1x128xf32> to vector<1x32xf32>
    %434 = vector.extract_strided_slice %431 {offsets = [0, 32], sizes = [1, 32], strides = [1, 1]} : vector<1x128xf32> to vector<1x32xf32>
    %435 = vector.extract_strided_slice %432 {offsets = [0, 64], sizes = [1, 32], strides = [1, 1]} : vector<1x128xf32> to vector<1x32xf32>
    %436 = vector.extract_strided_slice %431 {offsets = [0, 96], sizes = [1, 32], strides = [1, 1]} : vector<1x128xf32> to vector<1x32xf32>
    %437 = arith.mulf %434, %421 : vector<1x32xf32>
    %438 = arith.mulf %433, %435 : vector<1x32xf32>
    %439 = arith.addf %437, %438 : vector<1x32xf32>
    %440 = math.tanh %439 : vector<1x32xf32>
    %441 = arith.mulf %436, %440 : vector<1x32xf32>
    %442 = vector.extract_strided_slice %313 {offsets = [7, 0], sizes = [1, 128], strides = [1, 1]} : vector<8x128xf32> to vector<1x128xf32>
    %cst_74 = arith.constant dense<0.000000e+00> : vector<1x128xf32>
    %443 = tpu.matmul %441, %309, %cst_74 {dimension_numbers = #tpu.dot_dimension_numbers<[1], [0], [0], [1], [0, 0, 1, 1], [], []>} : vector<1x32xf32>, vector<32x128xf32>, vector<1x128xf32> -> vector<1x128xf32>
    %444 = arith.addf %442, %443 : vector<1x128xf32>
    %445 = arith.negf %444 : vector<1x128xf32>
    %446 = math.exp %445 : vector<1x128xf32>
    %cst_75 = arith.constant 1.000000e+00 : f32
    %447 = vector.broadcast %cst_75 : f32 to vector<1x128xf32>
    %448 = arith.addf %447, %446 : vector<1x128xf32>
    %449 = arith.divf %447, %448 : vector<1x128xf32>
    %450 = math.tanh %444 : vector<1x128xf32>
    %451 = vector.extract_strided_slice %449 {offsets = [0, 0], sizes = [1, 32], strides = [1, 1]} : vector<1x128xf32> to vector<1x32xf32>
    %452 = vector.extract_strided_slice %449 {offsets = [0, 32], sizes = [1, 32], strides = [1, 1]} : vector<1x128xf32> to vector<1x32xf32>
    %453 = vector.extract_strided_slice %450 {offsets = [0, 64], sizes = [1, 32], strides = [1, 1]} : vector<1x128xf32> to vector<1x32xf32>
    %454 = vector.extract_strided_slice %449 {offsets = [0, 96], sizes = [1, 32], strides = [1, 1]} : vector<1x128xf32> to vector<1x32xf32>
    %455 = arith.mulf %452, %439 : vector<1x32xf32>
    %456 = arith.mulf %451, %453 : vector<1x32xf32>
    %457 = arith.addf %455, %456 : vector<1x32xf32>
    %458 = math.tanh %457 : vector<1x32xf32>
    %459 = arith.mulf %454, %458 : vector<1x32xf32>
    %460 = tpu.concatenate %333, %351, %369, %387, %405, %423, %441, %459 in 0 : vector<1x32xf32>, vector<1x32xf32>, vector<1x32xf32>, vector<1x32xf32>, vector<1x32xf32>, vector<1x32xf32>, vector<1x32xf32>, vector<1x32xf32> -> vector<8x32xf32>
    %c0_76 = arith.constant 0 : index
    %c0_77 = arith.constant 0 : index
    %461 = vector.load %arg11[%c0_76, %c0_77] : memref<1x32xf32, #tpu.memory_space<vmem>>, vector<1x32xf32>
    %cst_78 = arith.constant dense<0.000000e+00> : vector<1x8xf32>
    %462 = tpu.matmul %461, %460, %cst_78 {dimension_numbers = #tpu.dot_dimension_numbers<[1], [1], [0], [0], [0, 0, 1, 0], [], []>} : vector<1x32xf32>, vector<8x32xf32>, vector<1x8xf32> -> vector<1x8xf32>
    %c0_79 = arith.constant 0 : index
    %c0_80 = arith.constant 0 : index
    %463 = vector.load %arg12[%c0_79, %c0_80] : memref<1x1xf32, #tpu.memory_space<vmem>>, vector<1x1xf32>
    %464 = vector.broadcast %463 : vector<1x1xf32> to vector<1x8xf32>
    %465 = arith.addf %462, %464 : vector<1x8xf32>
    %c0_81 = arith.constant 0 : index
    %c0_82 = arith.constant 0 : index
    %c0_83 = arith.constant 0 : index
    %466 = vector.load %arg13[%c0_81, %c0_82, %c0_83] : memref<1x1x8xf32, #tpu.memory_space<vmem>>, vector<1x1x8xf32>
    %467 = vector.shape_cast %466 : vector<1x1x8xf32> to vector<1x8xf32>
    %468 = vector.shape_cast %465 : vector<1x8xf32> to vector<1x1x8xf32>
    tpu.vector_store %arg13[%c0_81, %c0_82, %c0_83], %468 {strides = array<i32>} : memref<1x1x8xf32, #tpu.memory_space<vmem>>, vector<1x1x8xf32>,
    return
  }
  func.func @transform_0(%arg0: i32) -> (i32, i32, i32) {
    %c0_i32 = arith.constant 0 : i32
    %c0_i32_0 = arith.constant 0 : i32
    %c0_i32_1 = arith.constant 0 : i32
    return %arg0, %c0_i32, %c0_i32_0 : i32, i32, i32
  }
  func.func @transform_1(%arg0: i32) -> (i32, i32) {
    %c0_i32 = arith.constant 0 : i32
    %c0_i32_0 = arith.constant 0 : i32
    %c0_i32_1 = arith.constant 0 : i32
    return %c0_i32, %c0_i32_0 : i32, i32
  }
  func.func @transform_2(%arg0: i32) -> (i32, i32) {
    %c0_i32 = arith.constant 0 : i32
    %c0_i32_0 = arith.constant 0 : i32
    %c0_i32_1 = arith.constant 0 : i32
    return %c0_i32, %c0_i32_0 : i32, i32
  }
  func.func @transform_3(%arg0: i32) -> (i32, i32) {
    %c0_i32 = arith.constant 0 : i32
    %c0_i32_0 = arith.constant 0 : i32
    %c0_i32_1 = arith.constant 0 : i32
    return %c0_i32, %c0_i32_0 : i32, i32
  }
  func.func @transform_4(%arg0: i32) -> (i32, i32) {
    %c0_i32 = arith.constant 0 : i32
    %c0_i32_0 = arith.constant 0 : i32
    %c0_i32_1 = arith.constant 0 : i32
    return %c0_i32, %c0_i32_0 : i32, i32
  }
  func.func @transform_5(%arg0: i32) -> (i32, i32) {
    %c0_i32 = arith.constant 0 : i32
    %c0_i32_0 = arith.constant 0 : i32
    %c0_i32_1 = arith.constant 0 : i32
    return %c0_i32, %c0_i32_0 : i32, i32
  }
  func.func @transform_6(%arg0: i32) -> (i32, i32) {
    %c0_i32 = arith.constant 0 : i32
    %c0_i32_0 = arith.constant 0 : i32
    %c0_i32_1 = arith.constant 0 : i32
    return %c0_i32, %c0_i32_0 : i32, i32
  }
  func.func @transform_7(%arg0: i32) -> (i32, i32) {
    %c0_i32 = arith.constant 0 : i32
    %c0_i32_0 = arith.constant 0 : i32
    %c0_i32_1 = arith.constant 0 : i32
    return %c0_i32, %c0_i32_0 : i32, i32
  }
  func.func @transform_8(%arg0: i32) -> (i32, i32) {
    %c0_i32 = arith.constant 0 : i32
    %c0_i32_0 = arith.constant 0 : i32
    %c0_i32_1 = arith.constant 0 : i32
    return %c0_i32, %c0_i32_0 : i32, i32
  }
  func.func @transform_9(%arg0: i32) -> (i32, i32) {
    %c0_i32 = arith.constant 0 : i32
    %c0_i32_0 = arith.constant 0 : i32
    %c0_i32_1 = arith.constant 0 : i32
    return %c0_i32, %c0_i32_0 : i32, i32
  }
  func.func @transform_10(%arg0: i32) -> (i32, i32) {
    %c0_i32 = arith.constant 0 : i32
    %c0_i32_0 = arith.constant 0 : i32
    %c0_i32_1 = arith.constant 0 : i32
    return %c0_i32, %c0_i32_0 : i32, i32
  }
  func.func @transform_11(%arg0: i32) -> (i32, i32) {
    %c0_i32 = arith.constant 0 : i32
    %c0_i32_0 = arith.constant 0 : i32
    %c0_i32_1 = arith.constant 0 : i32
    return %c0_i32, %c0_i32_0 : i32, i32
  }
  func.func @transform_12(%arg0: i32) -> (i32, i32, i32) {
    %c0_i32 = arith.constant 0 : i32
    %c0_i32_0 = arith.constant 0 : i32
    %c0_i32_1 = arith.constant 0 : i32
    return %arg0, %c0_i32, %c0_i32_0 : i32, i32, i32
  }
}

</mosaic_0001>

<bundles_post_ra>
// kernel: decoder_lstm_forward.1
= control target key start
LH: loop header
LB: loop body
LE: loop exit
PB: predicated region body
PF: predicated region fallthrough
CT: control target
= control target key end

     0   :  { %s5477_s0 = inlined_call_operand.hbm [shape: f32[2,8,32], index: 0, kind: input, shape index: {}]   ;;  %s5478_s1 = inlined_call_operand.vmem [shape: f32[32,128], index: 1, kind: input, shape index: {}]   ;;  %s5479_s2 = inlined_call_operand.hbm [shape: f32[32,128], index: 2, kind: input, shape index: {}]   ;;  %s5480_s3 = inlined_call_operand.vmem [shape: f32[1,128], index: 3, kind: input, shape index: {}]   ;;  %s5481_s4 = inlined_call_operand.vmem [shape: f32[32,128], index: 4, kind: input, shape index: {}]   ;;  %s5482_s5 = inlined_call_operand.hbm [shape: f32[32,128], index: 5, kind: input, shape index: {}]   ;;  %s5483_s6 = inlined_call_operand.vmem [shape: f32[1,128], index: 6, kind: input, shape index: {}]   ;;  %s5484_s7 = inlined_call_operand.hbm [shape: f32[32,128], index: 7, kind: input, shape index: {}]   ;;  %s5485_s8 = inlined_call_operand.hbm [shape: f32[32,128], index: 8, kind: input, shape index: {}]   ;;  %s5486_s9 = inlined_call_operand.vmem [shape: f32[1,128], index: 9, kind: input, shape index: {}]   ;;  %s5487_s10 = inlined_call_operand.vmem [shape: f32[1,32], index: 10, kind: input, shape index: {}]   ;;  %s5488_s11 = inlined_call_operand.<no memory space> [shape: f32[1,1], index: 11, kind: input, shape index: {}]   ;;  %s5489_s12 = inlined_call_operand.hbm [shape: f32[2,1,8], index: 12, kind: output, shape index: {}]  }
   0x1   :  { %5494 = sst [smem:[#allocation17_spill]] %s5479_s2  ;;  %v17_v0 = vstv %s5488_s11 }
   0x2   :  { %5495 = sst [smem:[#allocation18_spill]] %s5486_s9  ;;  %18 = vst [vmem:[#allocation2] sm:$0x1] %v17_v0 }
   0x3   :  { %5496 = sst [smem:[#allocation19_spill]] %s5487_s10 }
   0x4   :  { %5497 = sst [smem:[#allocation20_spill]] %s5489_s12 }
   0x5   :  { %19 = vsyncpa [#allocation4], 0 }
   0x6   :  { %21 = vsyncpa [#allocation4 + $0x1], 0 }
   0x7   :  { %22 = vsyncpa [#allocation7], 0 }
   0x8   :  { %23 = vsyncpa [#allocation10], 0 }
   0x9   :  { %24 = vsyncpa [#allocation5], 0 }
   0xa   :  { %26 = vsyncpa [#allocation5 + $0x1], 0  ;;  %s4786_s23 = smov 0   ;;  %s4788_s24 = smov 0  }
   0xb   :  { %s4790_s25 = smov 0   ;;  %s4792_s26 = smov 0  }
   0xc LB: > { %s4704_s11 = smov [#allocation6]   ;;  %s4807_s28 = sadd.s32 4294967295, %s4702_s26   ;;  %s4702_s26 = sphi %s4792_s26, %s5522_s26   ;;  %s4698_s25 = sphi %s4790_s25, %s5521_s25   ;;  %s4694_s24 = sphi %s4788_s24, %s5520_s24   ;;  %s4690_s23 = sphi %s4786_s23, %s5519_s23  }
   0xd   : > { %s335_s27 = sshll.u32 %s4704_s11, 4  ;;  %p3527_p0 = scmp.ge.s32.totalorder %s4702_s26, 1  ;;  %s4812_s27 = int_to_ptr.vmem [resolvable:$true] %s335_s27 }
   0xe   : > { %p5491_p1 = scmp.eq.s32.totalorder %s4807_s28, 0  ;;  %p320_p2 = scmp.lt.s32.totalorder %s4702_s26, 3 }
   0xf   : > { %s4705_s30 = smov [#allocation9]   ;;  %s4706_s15 = smov [#allocation8]  }
  0x10   : > { %p4814_p3 = pnand %p3527_p0, %p320_p2  ;;  %s370_s13 = sshll.u32 %s4705_s30, 4  ;;  %s4827_s13 = int_to_ptr.vmem [resolvable:$true] %s370_s13 }
  0x11   : > { %s354_s16 = sshll.u32 %s4706_s15, 4  ;;  %s5500_s2 = sld [smem:[#allocation17_spill]]  ;;  %s4829_s16 = int_to_ptr.vmem [resolvable:$true] %s354_s16 }
  0x12   : > { %s5498_s29 = scalar_select %p4814_p3, 1, 0 }
  0x13   : > { %p4218_p5 = pneg %p4814_p3 }
  0x15   : > { %p4823_p6 = pnand %p4218_p5, %p5491_p1 }
  0x17   : > { %s4486_s19 = scalar_lea.hbm %s5500_s2, 512  ;;  %p4839_p8 = pneg %p4823_p6 }
  0x18   : > { %p4487_p7 = scmp.ne.s32.totalorder %s5500_s2, %s4486_s19  ;;  %p4493_p11 = scmp.lt.u32.totalorder %s4486_s19, %s5500_s2 }
  0x1a   : > { %p4489_p9 = pnand %p4839_p8, %p4487_p7 }
  0x1c   : > { %p4490_p10 = pneg %p4489_p9 }
  0x1e   : > { %p4495_p12 = pnand %p4493_p11, %p4490_p10 }
  0x20   : > { %4498 = shalt.err (!%p4495_p12)
}
  0x21   : > { %s4499_s15 = scalar_lea.vmem %s4812_s27, 512  ;;  %p4507_p5 = scmp.lt.s32.totalorder %s4812_s27, %s4812_s27 }
  0x22   : > { %p4500_p13 = scmp.ne.s32.totalorder %s4812_s27, %s4499_s15  ;;  %p4508_p4 = scmp.lt.s32.totalorder %s4499_s15, %s4499_s15 }
  0x24   : > { %p4502_p0 = pnand %p4500_p13, %p4839_p8  ;;  %p4509_p7 = por %p4508_p4, %p4507_p5 }
  0x26   : > { %p4503_p2 = pneg %p4502_p0 }
  0x28   : > { %p4510_p9 = pnand %p4509_p7, %p4503_p2 }
  0x2a   : > { %4513 = shalt.err (!%p4510_p9)
}
  0x2b   : > { %s4707_s17 = smov 128   ;;  %s4708_s18 = smov 8  }
  0x2c   : > { %4221 = dma.hbm_to_vmem [thread:$0]  (!%p4823_p6), %s5500_s2, 512, %s4812_s27, [#allocation7], %s4707_s17, %s4707_s17, %s4708_s18  }
  0x2d   : > { %s4514_s30 = scalar_lea.hbm %s5484_s7, 512 }
  0x2e   : > { %p4515_p4 = scmp.ne.s32.totalorder %s5484_s7, %s4514_s30  ;;  %p4521_p12 = scmp.lt.u32.totalorder %s4514_s30, %s5484_s7 }
  0x30   : > { %p4517_p10 = pnand %p4515_p4, %p4839_p8 }
  0x32   : > { %p4518_p11 = pneg %p4517_p10 }
  0x34   : > { %p4523_p13 = pnand %p4521_p12, %p4518_p11 }
  0x36   : > { %4526 = shalt.err (!%p4523_p13)
}
  0x37   : > { %s4527_s27 = scalar_lea.vmem %s4827_s13, 512  ;;  %p4535_p7 = scmp.lt.s32.totalorder %s4827_s13, %s4827_s13 }
  0x38   : > { %p4528_p0 = scmp.ne.s32.totalorder %s4827_s13, %s4527_s27  ;;  %p4536_p9 = scmp.lt.s32.totalorder %s4527_s27, %s4527_s27 }
  0x3a   : > { %p4530_p2 = pnand %p4528_p0, %p4839_p8  ;;  %p4537_p4 = por %p4536_p9, %p4535_p7 }
  0x3c   : > { %p4531_p5 = pneg %p4530_p2 }
  0x3e   : > { %p4538_p10 = pnand %p4537_p4, %p4531_p5 }
  0x40   : > { %4541 = shalt.err (!%p4538_p10)
}
  0x41   : > { %4227 = dma.hbm_to_vmem [thread:$0]  (!%p4823_p6), %s5484_s7, 512, %s4827_s13, [#allocation10], %s4707_s17, %s4707_s17, %s4708_s18  }
  0x42   : > { %s4542_s20 = scalar_lea.hbm %s5482_s5, 512 }
  0x43   : > { %p4543_p11 = scmp.ne.s32.totalorder %s5482_s5, %s4542_s20  ;;  %p4549_p0 = scmp.lt.u32.totalorder %s4542_s20, %s5482_s5 }
  0x45   : > { %p4545_p12 = pnand %p4543_p11, %p4839_p8 }
  0x47   : > { %p4546_p13 = pneg %p4545_p12 }
  0x49   : > { %p4551_p2 = pnand %p4549_p0, %p4546_p13 }
  0x4b   : > { %4554 = shalt.err (!%p4551_p2)
}
  0x4c   : > { %s4555_s13 = scalar_lea.vmem %s4829_s16, 512  ;;  %p4563_p4 = scmp.lt.s32.totalorder %s4829_s16, %s4829_s16 }
  0x4d   : > { %p4556_p5 = scmp.ne.s32.totalorder %s4829_s16, %s4555_s13  ;;  %p4564_p10 = scmp.lt.s32.totalorder %s4555_s13, %s4555_s13 }
  0x4f   : > { %p4558_p7 = pnand %p4556_p5, %p4839_p8  ;;  %p4565_p11 = por %p4564_p10, %p4563_p4 }
  0x51   : > { %p4559_p9 = pneg %p4558_p7 }
  0x53   : > { %p4566_p12 = pnand %p4565_p11, %p4559_p9 }
  0x55   : > { %4569 = shalt.err (!%p4566_p12)
}
  0x56   : > { %4224 = dma.hbm_to_vmem [thread:$0]  (!%p4823_p6), %s5482_s5, 512, %s4829_s16, [#allocation7], %s4707_s17, %s4707_s17, %s4708_s18  }
  0x57   : > { %s4709_s10 = smov [#allocation11]   ;;  %s4570_s21 = scalar_lea.hbm %s5485_s8, 512 }
  0x58   : > { %s383_s12 = sshll.u32 %s4709_s10, 4  ;;  %p4571_p13 = scmp.ne.s32.totalorder %s5485_s8, %s4570_s21  ;;  %s384_s12 = int_to_ptr.vmem [resolvable:$true] %s383_s12 }
  0x59   : > { %p4577_p5 = scmp.lt.u32.totalorder %s4570_s21, %s5485_s8 }
  0x5a   : > { %p4573_p0 = pnand %p4571_p13, %p4839_p8 }
  0x5c   : > { %p4574_p2 = pneg %p4573_p0 }
  0x5e   : > { %p4579_p7 = pnand %p4577_p5, %p4574_p2 }
  0x60   : > { %4582 = shalt.err (!%p4579_p7)
}
  0x61   : > { %s4583_s16 = scalar_lea.vmem %s384_s12, 512  ;;  %p4591_p11 = scmp.lt.s32.totalorder %s384_s12, %s384_s12 }
  0x62   : > { %p4584_p9 = scmp.ne.s32.totalorder %s384_s12, %s4583_s16  ;;  %p4592_p12 = scmp.lt.s32.totalorder %s4583_s16, %s4583_s16 }
  0x64   : > { %p4586_p4 = pnand %p4584_p9, %p4839_p8  ;;  %p4593_p1 = por %p4592_p12, %p4591_p11 }
  0x66   : > { %p4587_p10 = pneg %p4586_p4 }
  0x68   : > { %p4594_p3 = pnand %p4593_p1, %p4587_p10 }
  0x6a   : > { %4597 = shalt.err (!%p4594_p3)
}
  0x6b   : > { %4230 = dma.hbm_to_vmem [thread:$0]  (!%p4823_p6), %s5485_s8, 512, %s384_s12, [#allocation10], %s4707_s17, %s4707_s17, %s4708_s18  }
  0x6c   : > { %s3526_s14 = sadd.s32 4294967294, %s4702_s26   ;;  %s4938_s22 = sadd.s32 1, %s4702_s26  }
  0x6d   : > { %s36_s10 = ssub.s32 %s4702_s26, %s4938_s22  ;;  %s39_s19 = sadd.s32 1, %s4698_s25 }
  0x6e   : > { %p37_p1 = scmp.eq.s32.totalorder %s36_s10, 0  ;;  %p46_p3 = scmp.ne.s32.totalorder %s4698_s25, %s4694_s24 }
  0x6f   : > { %p47_p8 = scmp.eq.s32.totalorder %s4702_s26, 0  ;;  %p52_p13 = scmp.ne.s32.totalorder %s4694_s24, %s4690_s23 }
  0x70   : > { %s4949_s20 = scalar_select %p37_p1, %s4698_s25, %s39_s19  }
  0x71   : > { %p4951_p0 = por %p47_p8, %p46_p3  ;;  %p5503_p2 = scmp.eq.s32.totalorder %s4807_s28, 0 }
  0x72   : > { %p307_p5 = scmp.eq.s32.totalorder %s4807_s28, 1  ;;  %p313_p7 = scmp.eq.s32.totalorder %s3526_s14, 1 }
  0x73   : > { %p4957_p6 = por %p5503_p2, %p52_p13  ;;  %p4243_p9 = scmp.lt.s32.totalorder %s4702_s26, 2 }
  0x74   : > { %s406_s18 = sand.u32 1, %s4698_s25   ;;  %p4964_p4 = por %p307_p5, %p46_p3 }
  0x75   : > { %p4968_p10 = por %p313_p7, %p52_p13  ;;  %s3533_s30 = sshll.u32 %s406_s18, 3 }
  0x76   : > { %s5505_s12 = scalar_select %p4964_p4, 1, 0 }
  0x77   : > { %s5506_s11 = scalar_select %p4968_p10, 1, 0 }
  0x78   : > { %s3534_s15 = sshll.u32 %s4702_s26, 7  ;;  %s410_s9 = scalar_lea.vmem [#allocation3], %s3533_s30 }
  0x79   : > { %s4976_s27 = scalar_lea.hbm %s5477_s0, %s3534_s15  ;;  %s417_s14 = sshll.u32 %s410_s9, 4  ;;  %s4978_s14 = int_to_ptr.vmem [resolvable:$true] %s417_s14 }
  0x7a   : > { %p4982_p11 = pnand %p4243_p9, %p4951_p0  ;;  %s407_s19 = scalar_lea.sflag [#allocation4], %s406_s18 }
  0x7b   : > { %s4598_s2 = scalar_lea.hbm %s4976_s27, 128  ;;  %s4603_s13 = scalar_lea.hbm %s5477_s0, 256 }
  0x7c   : > { %p4599_p12 = scmp.ne.s32.totalorder %s4976_s27, %s4598_s2  ;;  %p4600_p1 = pneg %p4982_p11 }
  0x7d   : > { %p4604_p13 = scmp.lt.u32.totalorder %s4976_s27, %s5477_s0  ;;  %p4605_p0 = scmp.lt.u32.totalorder %s4603_s13, %s4598_s2 }
  0x7e   : > { %p4601_p3 = pnand %p4600_p1, %p4599_p12  ;;  %p4607_p5 = scmp.lt.u32.totalorder %s4598_s2, %s4976_s27 }
  0x7f   : > { %p4606_p2 = por %p4605_p0, %p4604_p13 }
  0x80   : > { %p4602_p8 = pneg %p4601_p3 }
  0x81   : > { %p4608_p7 = por %p4607_p5, %p4606_p2 }
  0x83   : > { %p4609_p9 = pnand %p4608_p7, %p4602_p8 }
  0x85   : > { %4612 = shalt.err (!%p4609_p9)
}
  0x86   : > { %s4613_s18 = scalar_lea.vmem %s4978_s14, 128  ;;  %s4710_s9 = smov [#allocation3]  }
  0x87   : > { %p4614_p12 = scmp.ne.s32.totalorder %s4978_s14, %s4613_s18  ;;  %s4618_s30 = sshll.u32 %s4710_s9, 4  ;;  %s4619_s30 = int_to_ptr.vmem [resolvable:$false] %s4618_s30 }
  0x88   : > { %s4620_s15 = scalar_lea.vmem %s4619_s30, 256  ;;  %p4621_p4 = scmp.lt.s32.totalorder %s4978_s14, %s4619_s30 }
  0x89   : > { %p4616_p3 = pnand %p4614_p12, %p4600_p1  ;;  %p4622_p13 = scmp.lt.s32.totalorder %s4620_s15, %s4613_s18 }
  0x8b   : > { %p4617_p10 = pneg %p4616_p3  ;;  %p4623_p0 = por %p4622_p13, %p4621_p4 }
  0x8d   : > { %p4624_p2 = pnand %p4623_p0, %p4617_p10 }
  0x8f   : > { %4627 = shalt.err (!%p4624_p2)
}
  0x90   : > { %4234 = dma.hbm_to_vmem [thread:$0]  (!%p4982_p11), %s4976_s27, 128, %s4978_s14, %s407_s19  }
  0x91   : > { %p5508_p8 = scmp.ne.s32.totalorder %s5498_s29, 0 }
  0x92   : > { %s5014_s2 = sand.u32 (!%p5508_p8), 1, %s4694_s24  }
  0x93   : > { %426 = sbr.rel (%p5508_p8) target bundleno = 17337 (0x43b9), region = 68  ;;  %s3536_s13 = sshll.u32 (!%p5508_p8), %s5014_s2, 3 }
  0x94   : > { %s429_s21 = scalar_lea.sflag (!%p5508_p8), [#allocation4], %s5014_s2  ;;  %s5018_s16 = scalar_lea.vmem (!%p5508_p8), [#allocation3], %s3536_s13 }
  0x9a   : > { %4673 = dma.done.wait (%p4957_p6), %s429_s21, 128  }
  0x9b   : > { %4675 = vsyncadd (%p4957_p6), %s429_s21, 4294967168  ;;  %p5509_p4 = scmp.eq.s32.totalorder %s4807_s28, 0 }
  0x9d   : > { %4677 = dma.done.wait (%p5509_p4), [#allocation7], 1024   ;;  %p5510_p10 = pmov %p5509_p4 }
  0x9e   : > { %p5511_p11 = pmov %p5509_p4 }
  0x9f   : > { %4679 = vsyncadd (%p5510_p10), [#allocation7], 4294966272 }
  0xa0   : > { %4681 = dma.done.wait (%p5511_p11), [#allocation10], 1024   ;;  %p5512_p1 = pmov %p5509_p4 }
  0xa1   : > { %v4711_v1 = vmov 0.0|0.0   ;;  %vm4712_vm0 = vmmov 0   ;;  %v4713_v2 = vmov 0.0   ;;  %v489_v3 = vld [vmem:[%s5478_s1] sm:$0xff]  ;;  %v490_v4 = vld [vmem:[%s5478_s1 + $0x8] sm:$0xff]  ;;  %v493_v5 = vld [vmem:[#allocation6] sm:$0xff] }
  0xa2   : > { %4683 = vsyncadd (%p5512_p1), [#allocation10], 4294966272  ;;  %4036 = vmatprep.subr.bf16.mxu0 %v4711_v1  ;;  %4042 = vmatprep.subr.bf16.mxu1 %v4711_v1  ;;  %v4037_v6 = vpack.c.bf16 %v490_v4, %v489_v3  ;;  %v494_v7 = vld [vmem:[#allocation6 + $0x8] sm:$0xff]  ;;  %v491_v8 = vld [vmem:[%s5478_s1 + $0x10] sm:$0xff]  ;;  %vm504_vm1 = vcmask 261120   ;;  %s4714_s13 = smov 64  }
  0xa3   : > { %3742 = vmatprep.mubr.msk.f32.mxu0 %vm4712_vm0, %v4713_v2  ;;  %3753 = vmatprep.mubr.msk.f32.mxu1 %vm4712_vm0, %v4713_v2  ;;  %v492_v9 = vld [vmem:[%s5478_s1 + $0x18] sm:$0xff]  ;;  %v5050_v10 = vpack.c.bf16 %v494_v7, %v493_v5  ;;  %v495_v11 = vld [vmem:[#allocation6 + $0x10] sm:$0xff]  ;;  %v496_v12 = vld [vmem:[#allocation6 + $0x18] sm:$0xff]  ;;  %s4715_s21 = smov 32   ;;  %vm1424_vm2 = vcmask 1040384   ;;  %vm1426_vm3 = vcmask 1041408  }
  0xa4   : > { %4038 = vmatpush3.bf16.msra.mxu0 %v4037_v6  ;;  %v4040_v13 = vpack.c.bf16 %v492_v9, %v491_v8  ;;  %v5054_v14 = vpack.c.bf16 %v496_v12, %v495_v11  ;;  %v488_v15 = vld [vmem:[%s5018_s16] sm:$0xff]  ;;  %v3541_v16 = vld [vmem:[%s5480_s3] ss:$0 sm:$0xff]  ;;  %vm1428_vm4 = vcmask 1042432   ;;  %vm1430_vm5 = vcmask 1043456   ;;  %s5513_s29 = sld [smem:[#allocation18_spill]] }
  0xa5   : > { %4044 = vmatpush3.bf16.msra.mxu1 %v5050_v10  ;;  %4039 = vmatprep.subr.bf16.mxu0 %v4711_v1  ;;  %vm1432_vm6 = vcmask 1044480   ;;  %vm1434_vm7 = vcmask 1045504   ;;  %vm1436_vm8 = vcmask 1046528   ;;  %s5514_s14 = sld [smem:[#allocation19_spill]]  ;;  %s487_s10 = scalar_lea.vmem [#allocation12], %s5014_s2  ;;  %vm3407_vm9 = vcmask 57344  }
  0xa6   : > { %4045 = vmatprep.subr.bf16.mxu1 %v4711_v1  ;;  %s3422_s19 = sshll.u32 %s487_s10, 4  ;;  %s5515_s9 = sld [smem:[#allocation20_spill]]  ;;  %s5435_s19 = int_to_ptr.vmem [resolvable:$true] %s3422_s19 }
  0xa7   : > { %s3410_s15 = scalar_lea.sflag [#allocation5], %s5014_s2  ;;  %s4628_s16 = scalar_lea.vmem %s5435_s19, 16 }
  0xa8   : > { %4041 = vmatpush3.bf16.msra.mxu0 %v4040_v13  ;;  %p4629_p6 = scmp.ne.s32.totalorder %s5435_s19, %s4628_s16  ;;  %p5516_p5 = scmp.ne.s32.totalorder %s5505_s12, 0 }
  0xa9   : > { %4047 = vmatpush3.bf16.msra.mxu1 %v5054_v14  ;;  %4048 = vmatprep.subr.bf16.mxu0 %v4711_v1 }
  0xaa   : > { %4054 = vmatprep.subr.bf16.mxu1 %v4711_v1  ;;  %p4630_p7 = pnand %p4629_p6, %p5516_p5 }
  0xab   : > { %3743 = vmatmul.mubr.msk.f32.vlgmr.msra.gmra.mrb[0].mxu0 %vm504_vm1, %v488_v15 }
  0xac   : > { %3754 = vmatmul.mubr.f32.vlgmr.msra.gmra.mrb[0].mxu1 %v4713_v2  ;;  %4050 = vmatpush3.bf16.msra.mxu0 %v5050_v10  ;;  %p4631_p9 = pneg %p4630_p7 }
  0xad   : > { %4051 = vmatprep.subr.bf16.mxu0 %v4711_v1  ;;  %3764 = vmatprep.mubr.msk.f32.mxu0 %vm4712_vm0, %v4713_v2 }
  0xae   : > { %4056 = vmatpush3.bf16.msra.mxu1 %v5050_v10  ;;  %3775 = vmatprep.mubr.msk.f32.mxu1 %vm4712_vm0, %v4713_v2 }
  0xaf   : > { %4057 = vmatprep.subr.bf16.mxu1 %v4711_v1 }
  0xb0   : > { %4053 = vmatpush3.bf16.msra.mxu0 %v5054_v14 }
  0xb1   : > { %4060 = vmatprep.subr.bf16.mxu0 %v4711_v1 }
  0xb2   : > { %4059 = vmatpush3.bf16.msra.mxu1 %v5054_v14 }
  0xb3   : > { %4066 = vmatprep.subr.bf16.mxu1 %v4711_v1 }
 0x17e   : > { %v574_v17 = vpop.f32.mrb[0].mxu0 }
 0x17f   : > { %v5078_v18 = vadd.f32 %v3541_v16, %v574_v17  ;;  %v3744_v19 = vpop.f32.mrb[1].mxu0  ;;  %v647_v20 = vpop.f32.mrb[0].mxu1 }
 0x180   : > { %v3755_v21 = vpop.f32.mrb[1].mxu1 }
 0x181   : > { %v651_v22 = vadd.f32 %v647_v20, %v5078_v18 }
 0x183   : > { %4294 = vtanh.f32 %v651_v22  ;;  %v3543_v24 = vmul.f32 -1.442695, %v651_v22 }
 0x185   : > { %4296 = vpow2.f32 %v3543_v24 }
 0x18d   : > { %v4295_v23 = vpop.eup %4294 }
 0x18e   : > { %661 = vrot.lane.b32.xlu0 %v4295_v23, %s4714_s13 }
 0x18f   : > { %v4297_v25 = vpop.eup %4296 }
 0x190   : > { %v655_v26 = vadd.f32 1.0, %v4297_v25 }
 0x192   : > { %4298 = vrcp.f32 %v655_v26 }
 0x19c   : > { %v4299_v27 = vpop.eup %4298 }
 0x19d   : > { %v659_v30 = vmul.f32 0.0, %v4299_v27 }
 0x200   : > { %v662_v28 = vpop.permute.xlu0 %661 }
 0x201   : > { %v664_v29 = vmul.f32 %v4299_v27, %v662_v28 }
 0x203   : > { %666 = vrot.lane.b32.xlu0 %v664_v29, %s4715_s21 }
 0x275   : > { %v667_v31 = vpop.permute.xlu0 %666 }
 0x276   : > { %v669_v32 = vadd.f32 %v667_v31, %v659_v30 }
 0x278   : > { %4300 = vtanh.f32 %v669_v32  ;;  %v763_v48 = vrot.slane %v669_v32, 7 }
 0x282   : > { %v4301_v33 = vpop.eup %4300 }
 0x283   : > { %672 = vrot.lane.b32.xlu1 %v4301_v33, %s4714_s13 }
 0x2f5   : > { %v673_v34 = vpop.permute.xlu1 %672 }
 0x2f6   : > { %v5084_v35 = vmul.f32 %v4299_v27, %v673_v34 }
 0x2f8   : > { %677 = vrot.lane.b32.xlu1 %v5084_v35, %s4715_s21 }
 0x36a   : > { %v678_v36 = vpop.permute.xlu1 %677 }
 0x36b   : > { %3765 = vmatmul.mubr.msk.f32.vlgmr.msra.gmra.mrb[2].mxu0 %vm504_vm1, %v678_v36 }
 0x36c   : > { %4062 = vmatpush3.bf16.msra.mxu0 %v5050_v10  ;;  %3786 = vmatprep.mubr.msk.f32.mxu0 %vm4712_vm0, %v4713_v2 }
 0x36d   : > { %4063 = vmatprep.subr.bf16.mxu0 %v4711_v1 }
 0x370   : > { %4065 = vmatpush3.bf16.msra.mxu0 %v5054_v14 }
 0x371   : > { %4072 = vmatprep.subr.bf16.mxu0 %v4711_v1 }
 0x43e   : > { %v747_v37 = vpop.f32.mrb[2].mxu0 }
 0x43f   : > { %v752_v38 = vrot.slane %v747_v37, 7  ;;  %v3766_v39 = vpop.f32.mrb[3].mxu0 }
 0x441   : > { %v754_v40 = vadd.f32 %v752_v38, %v5078_v18 }
 0x443   : > { %4302 = vtanh.f32 %v754_v40  ;;  %v3545_v42 = vmul.f32 -1.442695, %v754_v40 }
 0x445   : > { %4304 = vpow2.f32 %v3545_v42 }
 0x44d   : > { %v4303_v41 = vpop.eup %4302 }
 0x44e   : > { %767 = vrot.lane.b32.xlu0 %v4303_v41, %s4714_s13 }
 0x44f   : > { %v4305_v43 = vpop.eup %4304 }
 0x450   : > { %v758_v44 = vadd.f32 1.0, %v4305_v43 }
 0x452   : > { %4306 = vrcp.f32 %v758_v44 }
 0x45c   : > { %v4307_v45 = vpop.eup %4306 }
 0x45d   : > { %v765_v49 = vmul.f32 %v4307_v45, %v763_v48 }
 0x4c0   : > { %v768_v46 = vpop.permute.xlu0 %767 }
 0x4c1   : > { %v770_v47 = vmul.f32 %v4307_v45, %v768_v46 }
 0x4c3   : > { %772 = vrot.lane.b32.xlu1 %v770_v47, %s4715_s21 }
 0x535   : > { %v773_v50 = vpop.permute.xlu1 %772 }
 0x536   : > { %v775_v51 = vadd.f32 %v773_v50, %v765_v49 }
 0x538   : > { %4308 = vtanh.f32 %v775_v51  ;;  %v870_v6 = vrot.slane %v775_v51, 7 }
 0x542   : > { %v4309_v52 = vpop.eup %4308 }
 0x543   : > { %778 = vrot.lane.b32.xlu0 %v4309_v52, %s4714_s13 }
 0x5b5   : > { %v779_v53 = vpop.permute.xlu0 %778 }
 0x5b6   : > { %v781_v54 = vmul.f32 %v4307_v45, %v779_v53 }
 0x5b8   : > { %v783_v55 = vrot.slane %v781_v54, 1  ;;  %v1425_v15 = vsel %vm1424_vm2, %v5084_v35, %v781_v54 }
 0x5ba   : > { %784 = vrot.lane.b32.xlu1 %v783_v55, %s4715_s21 }
 0x62c   : > { %v785_v56 = vpop.permute.xlu1 %784 }
 0x62d   : > { %3776 = vmatmul.mubr.msk.f32.vlgmr.msra.gmra.mrb[2].mxu1 %vm504_vm1, %v785_v56 }
 0x62e   : > { %4068 = vmatpush3.bf16.msra.mxu1 %v5050_v10  ;;  %3797 = vmatprep.mubr.msk.f32.mxu1 %vm4712_vm0, %v4713_v2 }
 0x62f   : > { %4069 = vmatprep.subr.bf16.mxu1 %v4711_v1 }
 0x632   : > { %4071 = vmatpush3.bf16.msra.mxu1 %v5054_v14 }
 0x633   : > { %4078 = vmatprep.subr.bf16.mxu1 %v4711_v1 }
 0x700   : > { %v854_v57 = vpop.f32.mrb[2].mxu1 }
 0x701   : > { %v859_v58 = vrot.slane %v854_v57, 6  ;;  %v3777_v59 = vpop.f32.mrb[3].mxu1 }
 0x703   : > { %v861_v60 = vadd.f32 %v859_v58, %v5078_v18 }
 0x705   : > { %4310 = vtanh.f32 %v861_v60  ;;  %v3547_v62 = vmul.f32 -1.442695, %v861_v60 }
 0x707   : > { %4312 = vpow2.f32 %v3547_v62 }
 0x70f   : > { %v4311_v61 = vpop.eup %4310 }
 0x710   : > { %874 = vrot.lane.b32.xlu0 %v4311_v61, %s4714_s13 }
 0x711   : > { %v4313_v63 = vpop.eup %4312 }
 0x712   : > { %v865_v0 = vadd.f32 1.0, %v4313_v63 }
 0x714   : > { %4314 = vrcp.f32 %v865_v0 }
 0x71e   : > { %v4315_v3 = vpop.eup %4314 }
 0x71f   : > { %v872_v7 = vmul.f32 %v4315_v3, %v870_v6 }
 0x782   : > { %v875_v4 = vpop.permute.xlu0 %874 }
 0x783   : > { %v877_v5 = vmul.f32 %v4315_v3, %v875_v4 }
 0x785   : > { %879 = vrot.lane.b32.xlu1 %v877_v5, %s4715_s21 }
 0x7f7   : > { %v880_v8 = vpop.permute.xlu1 %879 }
 0x7f8   : > { %v882_v9 = vadd.f32 %v880_v8, %v872_v7 }
 0x7fa   : > { %4316 = vtanh.f32 %v882_v9  ;;  %v977_v31 = vrot.slane %v882_v9, 7 }
 0x804   : > { %v4317_v11 = vpop.eup %4316 }
 0x805   : > { %885 = vrot.lane.b32.xlu0 %v4317_v11, %s4714_s13 }
 0x877   : > { %v886_v12 = vpop.permute.xlu0 %885 }
 0x878   : > { %v888_v13 = vmul.f32 %v4315_v3, %v886_v12 }
 0x87a   : > { %v890_v16 = vrot.slane %v888_v13, 2  ;;  %v1427_v17 = vsel %vm1426_vm3, %v1425_v15, %v888_v13 }
 0x87c   : > { %891 = vrot.lane.b32.xlu1 %v890_v16, %s4715_s21 }
 0x8ee   : > { %v892_v19 = vpop.permute.xlu1 %891 }
 0x8ef   : > { %3787 = vmatmul.mubr.msk.f32.vlgmr.msra.gmra.mrb[4].mxu0 %vm504_vm1, %v892_v19 }
 0x8f0   : > { %4074 = vmatpush3.bf16.msra.mxu0 %v5050_v10  ;;  %3808 = vmatprep.mubr.msk.f32.mxu0 %vm4712_vm0, %v4713_v2 }
 0x8f1   : > { %4075 = vmatprep.subr.bf16.mxu0 %v4711_v1 }
 0x8f4   : > { %4077 = vmatpush3.bf16.msra.mxu0 %v5054_v14 }
 0x8f5   : > { %4084 = vmatprep.subr.bf16.mxu0 %v4711_v1 }
 0x9c2   : > { %v961_v20 = vpop.f32.mrb[4].mxu0 }
 0x9c3   : > { %v966_v21 = vrot.slane %v961_v20, 5  ;;  %v3788_v22 = vpop.f32.mrb[5].mxu0 }
 0x9c5   : > { %v968_v23 = vadd.f32 %v966_v21, %v5078_v18 }
 0x9c7   : > { %4318 = vtanh.f32 %v968_v23  ;;  %v3549_v25 = vmul.f32 -1.442695, %v968_v23 }
 0x9c9   : > { %4320 = vpow2.f32 %v3549_v25 }
 0x9d1   : > { %v4319_v24 = vpop.eup %4318 }
 0x9d2   : > { %981 = vrot.lane.b32.xlu0 %v4319_v24, %s4714_s13 }
 0x9d3   : > { %v4321_v26 = vpop.eup %4320 }
 0x9d4   : > { %v972_v27 = vadd.f32 1.0, %v4321_v26 }
 0x9d6   : > { %4322 = vrcp.f32 %v972_v27 }
 0x9e0   : > { %v4323_v28 = vpop.eup %4322 }
 0x9e1   : > { %v979_v32 = vmul.f32 %v4323_v28, %v977_v31 }
 0xa44   : > { %v982_v29 = vpop.permute.xlu0 %981 }
 0xa45   : > { %v984_v30 = vmul.f32 %v4323_v28, %v982_v29 }
 0xa47   : > { %986 = vrot.lane.b32.xlu1 %v984_v30, %s4715_s21 }
 0xab9   : > { %v987_v33 = vpop.permute.xlu1 %986 }
 0xaba   : > { %v989_v34 = vadd.f32 %v987_v33, %v979_v32 }
 0xabc   : > { %4324 = vtanh.f32 %v989_v34  ;;  %v1084_v52 = vrot.slane %v989_v34, 7 }
 0xac6   : > { %v4325_v35 = vpop.eup %4324 }
 0xac7   : > { %992 = vrot.lane.b32.xlu0 %v4325_v35, %s4714_s13 }
 0xb39   : > { %v993_v36 = vpop.permute.xlu0 %992 }
 0xb3a   : > { %v995_v37 = vmul.f32 %v4323_v28, %v993_v36 }
 0xb3c   : > { %v997_v38 = vrot.slane %v995_v37, 3  ;;  %v1429_v39 = vsel %vm1428_vm4, %v1427_v17, %v995_v37 }
 0xb3e   : > { %998 = vrot.lane.b32.xlu1 %v997_v38, %s4715_s21 }
 0xbb0   : > { %v999_v40 = vpop.permute.xlu1 %998 }
 0xbb1   : > { %3798 = vmatmul.mubr.msk.f32.vlgmr.msra.gmra.mrb[4].mxu1 %vm504_vm1, %v999_v40 }
 0xbb2   : > { %4080 = vmatpush3.bf16.msra.mxu1 %v5050_v10  ;;  %3819 = vmatprep.mubr.msk.f32.mxu1 %vm4712_vm0, %v4713_v2 }
 0xbb3   : > { %4081 = vmatprep.subr.bf16.mxu1 %v4711_v1 }
 0xbb6   : > { %4083 = vmatpush3.bf16.msra.mxu1 %v5054_v14 }
 0xbb7   : > { %4090 = vmatprep.subr.bf16.mxu1 %v4711_v1 }
 0xc84   : > { %v1068_v41 = vpop.f32.mrb[4].mxu1 }
 0xc85   : > { %v1073_v42 = vrot.slane %v1068_v41, 4  ;;  %v3799_v43 = vpop.f32.mrb[5].mxu1 }
 0xc87   : > { %v1075_v44 = vadd.f32 %v1073_v42, %v5078_v18 }
 0xc89   : > { %4326 = vtanh.f32 %v1075_v44  ;;  %v3551_v46 = vmul.f32 -1.442695, %v1075_v44 }
 0xc8b   : > { %4328 = vpow2.f32 %v3551_v46 }
 0xc93   : > { %v4327_v45 = vpop.eup %4326 }
 0xc94   : > { %1088 = vrot.lane.b32.xlu0 %v4327_v45, %s4714_s13 }
 0xc95   : > { %v4329_v47 = vpop.eup %4328 }
 0xc96   : > { %v1079_v48 = vadd.f32 1.0, %v4329_v47 }
 0xc98   : > { %4330 = vrcp.f32 %v1079_v48 }
 0xca2   : > { %v4331_v49 = vpop.eup %4330 }
 0xca3   : > { %v1086_v53 = vmul.f32 %v4331_v49, %v1084_v52 }
 0xd06   : > { %v1089_v50 = vpop.permute.xlu0 %1088 }
 0xd07   : > { %v1091_v51 = vmul.f32 %v4331_v49, %v1089_v50 }
 0xd09   : > { %1093 = vrot.lane.b32.xlu1 %v1091_v51, %s4715_s21 }
 0xd7b   : > { %v1094_v54 = vpop.permute.xlu1 %1093 }
 0xd7c   : > { %v1096_v55 = vadd.f32 %v1094_v54, %v1086_v53 }
 0xd7e   : > { %4332 = vtanh.f32 %v1096_v55 }
 0xd88   : > { %v4333_v56 = vpop.eup %4332 }
 0xd89   : > { %1099 = vrot.lane.b32.xlu0 %v4333_v56, %s4714_s13 }
 0xdfb   : > { %v1100_v57 = vpop.permute.xlu0 %1099 }
 0xdfc   : > { %v1102_v58 = vmul.f32 %v4331_v49, %v1100_v57 }
 0xdfe   : > { %v1104_v59 = vrot.slane %v1102_v58, 4  ;;  %v1431_v60 = vsel %vm1430_vm5, %v1429_v39, %v1102_v58  ;;  %v1439_v58 = vld [vmem:[%s5481_s4 + $0x8] sm:$0xff] }
 0xe00   : > { %1105 = vrot.lane.b32.xlu1 %v1104_v59, %s4715_s21  ;;  %v1442_v59 = vld [vmem:[#allocation8] sm:$0xff] }
 0xe72   : > { %v1106_v61 = vpop.permute.xlu1 %1105 }
 0xe73   : > { %3809 = vmatmul.mubr.msk.f32.vlgmr.msra.gmra.mrb[6].mxu0 %vm504_vm1, %v1106_v61  ;;  %v1443_v61 = vld [vmem:[#allocation8 + $0x8] sm:$0xff] }
 0xe74   : > { %4086 = vmatpush3.bf16.msra.mxu0 %v5050_v10  ;;  %3830 = vmatprep.mubr.msk.f32.mxu0 %vm4712_vm0, %v4713_v2 }
 0xe75   : > { %4087 = vmatprep.subr.bf16.mxu0 %v4711_v1 }
 0xe78   : > { %4089 = vmatpush3.bf16.msra.mxu0 %v5054_v14  ;;  %v1191_v14 = vrot.slane %v1096_v55, 7 }
 0xe79   : > { %4096 = vmatprep.subr.bf16.mxu0 %v4711_v1 }
 0xf46   : > { %v1175_v62 = vpop.f32.mrb[6].mxu0 }
 0xf47   : > { %v1180_v63 = vrot.slane %v1175_v62, 3  ;;  %v3810_v0 = vpop.f32.mrb[7].mxu0  ;;  %v1440_v62 = vld [vmem:[%s5481_s4 + $0x10] sm:$0xff] }
 0xf48   : > { %v5181_v0 = vpack.c.bf16 %v1443_v61, %v1442_v59 }
 0xf49   : > { %v1182_v3 = vadd.f32 %v1180_v63, %v5078_v18  ;;  %v1441_v63 = vld [vmem:[%s5481_s4 + $0x18] sm:$0xff] }
 0xf4b   : > { %4334 = vtanh.f32 %v1182_v3  ;;  %v3553_v5 = vmul.f32 -1.442695, %v1182_v3  ;;  %v1444_v3 = vld [vmem:[#allocation8 + $0x10] sm:$0xff] }
 0xf4d   : > { %4336 = vpow2.f32 %v3553_v5  ;;  %v4094_v5 = vpack.c.bf16 %v1441_v63, %v1440_v62 }
 0xf55   : > { %v4335_v4 = vpop.eup %4334 }
 0xf56   : > { %1195 = vrot.lane.b32.xlu0 %v4335_v4, %s4714_s13  ;;  %v1445_v4 = vld [vmem:[#allocation8 + $0x18] sm:$0xff] }
 0xf57   : > { %v4337_v10 = vpop.eup %4336 }
 0xf58   : > { %v1186_v6 = vadd.f32 1.0, %v4337_v10  ;;  %v5185_v10 = vpack.c.bf16 %v1445_v4, %v1444_v3 }
 0xf5a   : > { %4338 = vrcp.f32 %v1186_v6 }
 0xf64   : > { %v4339_v7 = vpop.eup %4338 }
 0xf65   : > { %v1193_v11 = vmul.f32 %v4339_v7, %v1191_v14 }
 0xfc8   : > { %v1196_v8 = vpop.permute.xlu0 %1195 }
 0xfc9   : > { %v1198_v9 = vmul.f32 %v4339_v7, %v1196_v8 }
 0xfcb   : > { %1200 = vrot.lane.b32.xlu1 %v1198_v9, %s4715_s21 }
0x103d   : > { %v1201_v12 = vpop.permute.xlu1 %1200 }
0x103e   : > { %v1203_v13 = vadd.f32 %v1201_v12, %v1193_v11 }
0x1040   : > { %4340 = vtanh.f32 %v1203_v13  ;;  %v1298_v33 = vrot.slane %v1203_v13, 7  ;;  %v3558_v13 = vld [vmem:[%s5483_s6] ss:$0 sm:$0xff] }
0x104a   : > { %v4341_v15 = vpop.eup %4340 }
0x104b   : > { %1206 = vrot.lane.b32.xlu0 %v4341_v15, %s4714_s13 }
0x10bd   : > { %v1207_v16 = vpop.permute.xlu0 %1206 }
0x10be   : > { %v1209_v17 = vmul.f32 %v4339_v7, %v1207_v16 }
0x10c0   : > { %v1211_v19 = vrot.slane %v1209_v17, 5  ;;  %v1433_v20 = vsel %vm1432_vm6, %v1431_v60, %v1209_v17 }
0x10c2   : > { %1212 = vrot.lane.b32.xlu1 %v1211_v19, %s4715_s21 }
0x1134   : > { %v1213_v21 = vpop.permute.xlu1 %1212 }
0x1135   : > { %3820 = vmatmul.mubr.msk.f32.vlgmr.msra.gmra.mrb[6].mxu1 %vm504_vm1, %v1213_v21 }
0x1136   : > { %3841 = vmatprep.mubr.msk.f32.mxu1 %vm4712_vm0, %v4713_v2 }
0x1208   : > { %v1282_v22 = vpop.f32.mrb[6].mxu1 }
0x1209   : > { %v1287_v23 = vrot.slane %v1282_v22, 2  ;;  %v3821_v24 = vpop.f32.mrb[7].mxu1 }
0x120b   : > { %v1289_v25 = vadd.f32 %v1287_v23, %v5078_v18 }
0x120d   : > { %4342 = vtanh.f32 %v1289_v25  ;;  %v3555_v27 = vmul.f32 -1.442695, %v1289_v25 }
0x120f   : > { %4344 = vpow2.f32 %v3555_v27 }
0x1217   : > { %v4343_v26 = vpop.eup %4342 }
0x1218   : > { %1302 = vrot.lane.b32.xlu0 %v4343_v26, %s4714_s13 }
0x1219   : > { %v4345_v28 = vpop.eup %4344 }
0x121a   : > { %v1293_v29 = vadd.f32 1.0, %v4345_v28 }
0x121c   : > { %4346 = vrcp.f32 %v1293_v29 }
0x1226   : > { %v4347_v30 = vpop.eup %4346 }
0x1227   : > { %v1300_v34 = vmul.f32 %v4347_v30, %v1298_v33 }
0x128a   : > { %v1303_v31 = vpop.permute.xlu0 %1302 }
0x128b   : > { %v1305_v32 = vmul.f32 %v4347_v30, %v1303_v31 }
0x128d   : > { %1307 = vrot.lane.b32.xlu1 %v1305_v32, %s4715_s21 }
0x12ff   : > { %v1308_v35 = vpop.permute.xlu1 %1307 }
0x1300   : > { %v1310_v36 = vadd.f32 %v1308_v35, %v1300_v34 }
0x1302   : > { %4348 = vtanh.f32 %v1310_v36  ;;  %v1405_v54 = vrot.slane %v1310_v36, 7 }
0x130c   : > { %v4349_v37 = vpop.eup %4348 }
0x130d   : > { %1313 = vrot.lane.b32.xlu0 %v4349_v37, %s4714_s13 }
0x137f   : > { %v1314_v38 = vpop.permute.xlu0 %1313 }
0x1380   : > { %v1316_v39 = vmul.f32 %v4347_v30, %v1314_v38 }
0x1382   : > { %v1318_v40 = vrot.slane %v1316_v39, 6  ;;  %v1435_v41 = vsel %vm1434_vm7, %v1433_v20, %v1316_v39 }
0x1384   : > { %1319 = vrot.lane.b32.xlu1 %v1318_v40, %s4715_s21 }
0x13f6   : > { %v1320_v42 = vpop.permute.xlu1 %1319 }
0x13f7   : > { %3831 = vmatmul.mubr.msk.f32.vlgmr.msra.gmra.mrb[8].mxu0 %vm504_vm1, %v1320_v42 }
0x13f8   : > { %3852 = vmatprep.mubr.msk.f32.mxu0 %vm4712_vm0, %v4713_v2  ;;  %4098 = vmatpush3.bf16.msra.mxu0 %v5181_v0 }
0x13f9   : > { %4099 = vmatprep.subr.bf16.mxu0 %v4711_v1 }
0x13fc   : > { %4101 = vmatpush3.bf16.msra.mxu0 %v5185_v10 }
0x13fd   : > { %4108 = vmatprep.subr.bf16.mxu0 %v4711_v1 }
0x13ff   : > { %3853 = vmatmul.mubr.f32.vlgmr.msra.gmra.mrb[10].mxu0 %v4713_v2 }
0x1400   : > { %4110 = vmatpush3.bf16.msra.mxu0 %v5181_v0  ;;  %3874 = vmatprep.mubr.msk.f32.mxu0 %vm4712_vm0, %v4713_v2 }
0x1401   : > { %4111 = vmatprep.subr.bf16.mxu0 %v4711_v1 }
0x1404   : > { %4113 = vmatpush3.bf16.msra.mxu0 %v5185_v10 }
0x1405   : > { %4120 = vmatprep.subr.bf16.mxu0 %v4711_v1 }
0x14ca   : > { %v1389_v43 = vpop.f32.mrb[8].mxu0 }
0x14cb   : > { %v1394_v44 = vrot.slane %v1389_v43, 1  ;;  %v3832_v45 = vpop.f32.mrb[9].mxu0 }
0x14cd   : > { %v1396_v46 = vadd.f32 %v1394_v44, %v5078_v18  ;;  %v1438_v18 = vld [vmem:[%s5481_s4] sm:$0xff] }
0x14ce   : > { %v4091_v60 = vpack.c.bf16 %v1439_v58, %v1438_v18 }
0x14cf   : > { %4350 = vtanh.f32 %v1396_v46  ;;  %v3557_v48 = vmul.f32 -1.442695, %v1396_v46 }
0x14d0   : > { %4092 = vmatpush3.bf16.msra.mxu1 %v4091_v60 }
0x14d1   : > { %4352 = vpow2.f32 %v3557_v48  ;;  %4093 = vmatprep.subr.bf16.mxu1 %v4711_v1 }
0x14d2   : > { %v1594_v11 = vpop.f32.mrb[10].mxu0 }
0x14d3   : > { %v3854_v12 = vpop.f32.mrb[11].mxu0 }
0x14d4   : > { %4095 = vmatpush3.bf16.msra.mxu1 %v4094_v5 }
0x14d5   : > { %4102 = vmatprep.subr.bf16.mxu1 %v4711_v1 }
0x14d9   : > { %v4351_v47 = vpop.eup %4350 }
0x14da   : > { %1409 = vrot.lane.b32.xlu0 %v4351_v47, %s4714_s13 }
0x14db   : > { %v4353_v49 = vpop.eup %4352 }
0x14dc   : > { %v1400_v50 = vadd.f32 1.0, %v4353_v49 }
0x14de   : > { %4354 = vrcp.f32 %v1400_v50 }
0x14e8   : > { %v4355_v51 = vpop.eup %4354 }
0x14e9   : > { %v1407_v55 = vmul.f32 %v4355_v51, %v1405_v54 }
0x154c   : > { %v1410_v52 = vpop.permute.xlu0 %1409 }
0x154d   : > { %v1412_v53 = vmul.f32 %v4355_v51, %v1410_v52 }
0x154f   : > { %1414 = vrot.lane.b32.xlu1 %v1412_v53, %s4715_s21 }
0x15c1   : > { %v1415_v56 = vpop.permute.xlu1 %1414 }
0x15c2   : > { %v1417_v57 = vadd.f32 %v1415_v56, %v1407_v55 }
0x15c4   : > { %4356 = vtanh.f32 %v1417_v57 }
0x15ce   : > { %v4357_v6 = vpop.eup %4356 }
0x15cf   : > { %1420 = vrot.lane.b32.xlu0 %v4357_v6, %s4714_s13 }
0x1641   : > { %v1421_v7 = vpop.permute.xlu0 %1420 }
0x1642   : > { %v1423_v8 = vmul.f32 %v4355_v51, %v1421_v7 }
0x1644   : > { %v1437_v9 = vsel %vm1436_vm8, %v1435_v41, %v1423_v8 }
0x1645   : > { %1454 = vrot.lane.b32.xlu1 %v1437_v9, %s4715_s21 }
0x16b7   : > { %v1455_v14 = vpop.permute.xlu1 %1454 }
0x16b8   : > { %3842 = vmatmul.mubr.msk.f32.vlgmr.msra.gmra.mrb[8].mxu1 %vm504_vm1, %v1455_v14 }
0x16b9   : > { %4104 = vmatpush3.bf16.msra.mxu1 %v5181_v0  ;;  %3863 = vmatprep.mubr.msk.f32.mxu1 %vm4712_vm0, %v4713_v2 }
0x16ba   : > { %4105 = vmatprep.subr.bf16.mxu1 %v4711_v1 }
0x16bd   : > { %4107 = vmatpush3.bf16.msra.mxu1 %v5185_v10 }
0x16be   : > { %4114 = vmatprep.subr.bf16.mxu1 %v4711_v1 }
0x178b   : > { %v1524_v15 = vpop.f32.mrb[8].mxu1 }
0x178c   : > { %v5211_v16 = vadd.f32 %v3558_v13, %v1524_v15  ;;  %v3843_v17 = vpop.f32.mrb[9].mxu1 }
0x178e   : > { %v1598_v19 = vadd.f32 %v1594_v11, %v5211_v16 }
0x1790   : > { %4358 = vtanh.f32 %v1598_v19  ;;  %v3560_v21 = vmul.f32 -1.442695, %v1598_v19 }
0x1792   : > { %4360 = vpow2.f32 %v3560_v21 }
0x179a   : > { %v4359_v20 = vpop.eup %4358 }
0x179b   : > { %1608 = vrot.lane.b32.xlu0 %v4359_v20, %s4714_s13 }
0x179c   : > { %v4361_v22 = vpop.eup %4360 }
0x179d   : > { %v1602_v23 = vadd.f32 1.0, %v4361_v22 }
0x179f   : > { %4362 = vrcp.f32 %v1602_v23 }
0x17a9   : > { %v4363_v24 = vpop.eup %4362 }
0x17aa   : > { %v1606_v27 = vmul.f32 0.0, %v4363_v24 }
0x180d   : > { %v1609_v25 = vpop.permute.xlu0 %1608 }
0x180e   : > { %v1611_v26 = vmul.f32 %v4363_v24, %v1609_v25 }
0x1810   : > { %1613 = vrot.lane.b32.xlu1 %v1611_v26, %s4715_s21 }
0x1882   : > { %v1614_v28 = vpop.permute.xlu1 %1613 }
0x1883   : > { %v1616_v29 = vadd.f32 %v1614_v28, %v1606_v27 }
0x1885   : > { %4364 = vtanh.f32 %v1616_v29  ;;  %v1710_v45 = vrot.slane %v1616_v29, 7 }
0x188f   : > { %v4365_v30 = vpop.eup %4364 }
0x1890   : > { %1619 = vrot.lane.b32.xlu0 %v4365_v30, %s4714_s13 }
0x1902   : > { %v1620_v31 = vpop.permute.xlu0 %1619 }
0x1903   : > { %v5217_v32 = vmul.f32 %v4363_v24, %v1620_v31 }
0x1905   : > { %1624 = vrot.lane.b32.xlu1 %v5217_v32, %s4715_s21 }
0x1977   : > { %v1625_v33 = vpop.permute.xlu1 %1624 }
0x1978   : > { %3864 = vmatmul.mubr.msk.f32.vlgmr.msra.gmra.mrb[10].mxu1 %vm504_vm1, %v1625_v33 }
0x1979   : > { %4116 = vmatpush3.bf16.msra.mxu1 %v5181_v0  ;;  %3885 = vmatprep.mubr.msk.f32.mxu1 %vm4712_vm0, %v4713_v2 }
0x197a   : > { %4117 = vmatprep.subr.bf16.mxu1 %v4711_v1 }
0x197d   : > { %4119 = vmatpush3.bf16.msra.mxu1 %v5185_v10 }
0x197e   : > { %4126 = vmatprep.subr.bf16.mxu1 %v4711_v1 }
0x1a4b   : > { %v1694_v34 = vpop.f32.mrb[10].mxu1 }
0x1a4c   : > { %v1699_v35 = vrot.slane %v1694_v34, 7  ;;  %v3865_v36 = vpop.f32.mrb[11].mxu1 }
0x1a4e   : > { %v1701_v37 = vadd.f32 %v1699_v35, %v5211_v16 }
0x1a50   : > { %4366 = vtanh.f32 %v1701_v37  ;;  %v3562_v39 = vmul.f32 -1.442695, %v1701_v37 }
0x1a52   : > { %4368 = vpow2.f32 %v3562_v39 }
0x1a5a   : > { %v4367_v38 = vpop.eup %4366 }
0x1a5b   : > { %1714 = vrot.lane.b32.xlu0 %v4367_v38, %s4714_s13 }
0x1a5c   : > { %v4369_v40 = vpop.eup %4368 }
0x1a5d   : > { %v1705_v41 = vadd.f32 1.0, %v4369_v40 }
0x1a5f   : > { %4370 = vrcp.f32 %v1705_v41 }
0x1a69   : > { %v4371_v42 = vpop.eup %4370 }
0x1a6a   : > { %v1712_v46 = vmul.f32 %v4371_v42, %v1710_v45 }
0x1acd   : > { %v1715_v43 = vpop.permute.xlu0 %1714 }
0x1ace   : > { %v1717_v44 = vmul.f32 %v4371_v42, %v1715_v43 }
0x1ad0   : > { %1719 = vrot.lane.b32.xlu1 %v1717_v44, %s4715_s21 }
0x1b42   : > { %v1720_v47 = vpop.permute.xlu1 %1719 }
0x1b43   : > { %v1722_v48 = vadd.f32 %v1720_v47, %v1712_v46 }
0x1b45   : > { %4372 = vtanh.f32 %v1722_v48  ;;  %v1817_v3 = vrot.slane %v1722_v48, 7 }
0x1b4f   : > { %v4373_v49 = vpop.eup %4372 }
0x1b50   : > { %1725 = vrot.lane.b32.xlu0 %v4373_v49, %s4714_s13 }
0x1bc2   : > { %v1726_v50 = vpop.permute.xlu0 %1725 }
0x1bc3   : > { %v1728_v51 = vmul.f32 %v4371_v42, %v1726_v50 }
0x1bc5   : > { %v1730_v52 = vrot.slane %v1728_v51, 1  ;;  %v2371_v14 = vsel %vm1424_vm2, %v5217_v32, %v1728_v51 }
0x1bc7   : > { %1731 = vrot.lane.b32.xlu1 %v1730_v52, %s4715_s21 }
0x1c39   : > { %v1732_v53 = vpop.permute.xlu1 %1731 }
0x1c3a   : > { %3875 = vmatmul.mubr.msk.f32.vlgmr.msra.gmra.mrb[12].mxu0 %vm504_vm1, %v1732_v53 }
0x1c3b   : > { %4122 = vmatpush3.bf16.msra.mxu0 %v5181_v0  ;;  %3896 = vmatprep.mubr.msk.f32.mxu0 %vm4712_vm0, %v4713_v2 }
0x1c3c   : > { %4123 = vmatprep.subr.bf16.mxu0 %v4711_v1 }
0x1c3f   : > { %4125 = vmatpush3.bf16.msra.mxu0 %v5185_v10 }
0x1c40   : > { %4132 = vmatprep.subr.bf16.mxu0 %v4711_v1 }
0x1d0d   : > { %v1801_v54 = vpop.f32.mrb[12].mxu0 }
0x1d0e   : > { %v1806_v55 = vrot.slane %v1801_v54, 6  ;;  %v3876_v56 = vpop.f32.mrb[13].mxu0 }
0x1d10   : > { %v1808_v57 = vadd.f32 %v1806_v55, %v5211_v16 }
0x1d12   : > { %4374 = vtanh.f32 %v1808_v57  ;;  %v3564_v58 = vmul.f32 -1.442695, %v1808_v57 }
0x1d14   : > { %4376 = vpow2.f32 %v3564_v58 }
0x1d1c   : > { %v4375_v18 = vpop.eup %4374 }
0x1d1d   : > { %1821 = vrot.lane.b32.xlu0 %v4375_v18, %s4714_s13 }
0x1d1e   : > { %v4377_v59 = vpop.eup %4376 }
0x1d1f   : > { %v1812_v60 = vadd.f32 1.0, %v4377_v59 }
0x1d21   : > { %4378 = vrcp.f32 %v1812_v60 }
0x1d2b   : > { %v4379_v61 = vpop.eup %4378 }
0x1d2c   : > { %v1819_v4 = vmul.f32 %v4379_v61, %v1817_v3 }
0x1d8f   : > { %v1822_v62 = vpop.permute.xlu0 %1821 }
0x1d90   : > { %v1824_v63 = vmul.f32 %v4379_v61, %v1822_v62 }
0x1d92   : > { %1826 = vrot.lane.b32.xlu1 %v1824_v63, %s4715_s21 }
0x1e04   : > { %v1827_v5 = vpop.permute.xlu1 %1826 }
0x1e05   : > { %v1829_v6 = vadd.f32 %v1827_v5, %v1819_v4 }
0x1e07   : > { %4380 = vtanh.f32 %v1829_v6  ;;  %v1924_v28 = vrot.slane %v1829_v6, 7 }
0x1e11   : > { %v4381_v7 = vpop.eup %4380 }
0x1e12   : > { %1832 = vrot.lane.b32.xlu0 %v4381_v7, %s4714_s13 }
0x1e84   : > { %v1833_v8 = vpop.permute.xlu0 %1832 }
0x1e85   : > { %v1835_v9 = vmul.f32 %v4379_v61, %v1833_v8 }
0x1e87   : > { %v1837_v11 = vrot.slane %v1835_v9, 2  ;;  %v2372_v12 = vsel %vm1426_vm3, %v2371_v14, %v1835_v9 }
0x1e89   : > { %1838 = vrot.lane.b32.xlu1 %v1837_v11, %s4715_s21 }
0x1efb   : > { %v1839_v13 = vpop.permute.xlu1 %1838 }
0x1efc   : > { %3886 = vmatmul.mubr.msk.f32.vlgmr.msra.gmra.mrb[12].mxu1 %vm504_vm1, %v1839_v13 }
0x1efd   : > { %4128 = vmatpush3.bf16.msra.mxu1 %v5181_v0  ;;  %3907 = vmatprep.mubr.msk.f32.mxu1 %vm4712_vm0, %v4713_v2 }
0x1efe   : > { %4129 = vmatprep.subr.bf16.mxu1 %v4711_v1 }
0x1f01   : > { %4131 = vmatpush3.bf16.msra.mxu1 %v5185_v10 }
0x1f02   : > { %4138 = vmatprep.subr.bf16.mxu1 %v4711_v1 }
0x1fcf   : > { %v1908_v15 = vpop.f32.mrb[12].mxu1 }
0x1fd0   : > { %v1913_v17 = vrot.slane %v1908_v15, 5  ;;  %v3887_v19 = vpop.f32.mrb[13].mxu1 }
0x1fd2   : > { %v1915_v20 = vadd.f32 %v1913_v17, %v5211_v16 }
0x1fd4   : > { %4382 = vtanh.f32 %v1915_v20  ;;  %v3566_v22 = vmul.f32 -1.442695, %v1915_v20 }
0x1fd6   : > { %4384 = vpow2.f32 %v3566_v22 }
0x1fde   : > { %v4383_v21 = vpop.eup %4382 }
0x1fdf   : > { %1928 = vrot.lane.b32.xlu0 %v4383_v21, %s4714_s13 }
0x1fe0   : > { %v4385_v23 = vpop.eup %4384 }
0x1fe1   : > { %v1919_v24 = vadd.f32 1.0, %v4385_v23 }
0x1fe3   : > { %4386 = vrcp.f32 %v1919_v24 }
0x1fed   : > { %v4387_v25 = vpop.eup %4386 }
0x1fee   : > { %v1926_v29 = vmul.f32 %v4387_v25, %v1924_v28 }
0x2051   : > { %v1929_v26 = vpop.permute.xlu0 %1928 }
0x2052   : > { %v1931_v27 = vmul.f32 %v4387_v25, %v1929_v26 }
0x2054   : > { %1933 = vrot.lane.b32.xlu1 %v1931_v27, %s4715_s21 }
0x20c6   : > { %v1934_v30 = vpop.permute.xlu1 %1933 }
0x20c7   : > { %v1936_v31 = vadd.f32 %v1934_v30, %v1926_v29 }
0x20c9   : > { %4388 = vtanh.f32 %v1936_v31  ;;  %v2031_v49 = vrot.slane %v1936_v31, 7 }
0x20d3   : > { %v4389_v32 = vpop.eup %4388 }
0x20d4   : > { %1939 = vrot.lane.b32.xlu0 %v4389_v32, %s4714_s13 }
0x2146   : > { %v1940_v33 = vpop.permute.xlu0 %1939 }
0x2147   : > { %v1942_v34 = vmul.f32 %v4387_v25, %v1940_v33 }
0x2149   : > { %v1944_v35 = vrot.slane %v1942_v34, 3  ;;  %v2373_v36 = vsel %vm1428_vm4, %v2372_v12, %v1942_v34 }
0x214b   : > { %1945 = vrot.lane.b32.xlu1 %v1944_v35, %s4715_s21 }
0x21bd   : > { %v1946_v37 = vpop.permute.xlu1 %1945 }
0x21be   : > { %3897 = vmatmul.mubr.msk.f32.vlgmr.msra.gmra.mrb[14].mxu0 %vm504_vm1, %v1946_v37 }
0x21bf   : > { %4134 = vmatpush3.bf16.msra.mxu0 %v5181_v0  ;;  %3918 = vmatprep.mubr.msk.f32.mxu0 %vm4712_vm0, %v4713_v2 }
0x21c0   : > { %4135 = vmatprep.subr.bf16.mxu0 %v4711_v1 }
0x21c3   : > { %4137 = vmatpush3.bf16.msra.mxu0 %v5185_v10 }
0x21c4   : > { %4144 = vmatprep.subr.bf16.mxu0 %v4711_v1 }
0x2291   : > { %v2015_v38 = vpop.f32.mrb[14].mxu0 }
0x2292   : > { %v2020_v39 = vrot.slane %v2015_v38, 4  ;;  %v3898_v40 = vpop.f32.mrb[15].mxu0 }
0x2294   : > { %v2022_v41 = vadd.f32 %v2020_v39, %v5211_v16 }
0x2296   : > { %4390 = vtanh.f32 %v2022_v41  ;;  %v3568_v43 = vmul.f32 -1.442695, %v2022_v41 }
0x2298   : > { %4392 = vpow2.f32 %v3568_v43 }
0x22a0   : > { %v4391_v42 = vpop.eup %4390 }
0x22a1   : > { %2035 = vrot.lane.b32.xlu0 %v4391_v42, %s4714_s13 }
0x22a2   : > { %v4393_v44 = vpop.eup %4392 }
0x22a3   : > { %v2026_v45 = vadd.f32 1.0, %v4393_v44 }
0x22a5   : > { %4394 = vrcp.f32 %v2026_v45 }
0x22af   : > { %v4395_v46 = vpop.eup %4394 }
0x22b0   : > { %v2033_v50 = vmul.f32 %v4395_v46, %v2031_v49 }
0x2313   : > { %v2036_v47 = vpop.permute.xlu0 %2035 }
0x2314   : > { %v2038_v48 = vmul.f32 %v4395_v46, %v2036_v47 }
0x2316   : > { %2040 = vrot.lane.b32.xlu1 %v2038_v48, %s4715_s21 }
0x2388   : > { %v2041_v51 = vpop.permute.xlu1 %2040 }
0x2389   : > { %v2043_v52 = vadd.f32 %v2041_v51, %v2033_v50 }
0x238b   : > { %4396 = vtanh.f32 %v2043_v52 }
0x2395   : > { %v4397_v53 = vpop.eup %4396 }
0x2396   : > { %2046 = vrot.lane.b32.xlu0 %v4397_v53, %s4714_s13 }
0x2408   : > { %v2047_v54 = vpop.permute.xlu0 %2046 }
0x2409   : > { %v2049_v55 = vmul.f32 %v4395_v46, %v2047_v54 }
0x240b   : > { %v2051_v56 = vrot.slane %v2049_v55, 4  ;;  %v2374_v57 = vsel %vm1430_vm5, %v2373_v36, %v2049_v55  ;;  %v2379_v55 = vld [vmem:[#allocation9 + $0x8] sm:$0xff] }
0x240d   : > { %2052 = vrot.lane.b32.xlu1 %v2051_v56, %s4715_s21  ;;  %v2382_v56 = vld [vmem:[#allocation11] sm:$0xff] }
0x247f   : > { %v2053_v18 = vpop.permute.xlu1 %2052 }
0x2480   : > { %3908 = vmatmul.mubr.msk.f32.vlgmr.msra.gmra.mrb[14].mxu1 %vm504_vm1, %v2053_v18  ;;  %v2383_v18 = vld [vmem:[#allocation11 + $0x8] sm:$0xff] }
0x2481   : > { %4140 = vmatpush3.bf16.msra.mxu1 %v5181_v0  ;;  %3929 = vmatprep.mubr.msk.f32.mxu1 %vm4712_vm0, %v4713_v2 }
0x2482   : > { %4141 = vmatprep.subr.bf16.mxu1 %v4711_v1 }
0x2485   : > { %4143 = vmatpush3.bf16.msra.mxu1 %v5185_v10  ;;  %v2138_v10 = vrot.slane %v2043_v52, 7 }
0x2486   : > { %4150 = vmatprep.subr.bf16.mxu1 %v4711_v1 }
0x2553   : > { %v2122_v58 = vpop.f32.mrb[14].mxu1 }
0x2554   : > { %v2127_v59 = vrot.slane %v2122_v58, 3  ;;  %v3909_v60 = vpop.f32.mrb[15].mxu1  ;;  %v2380_v58 = vld [vmem:[#allocation9 + $0x10] sm:$0xff] }
0x2555   : > { %v5302_v60 = vpack.c.bf16 %v2383_v18, %v2382_v56 }
0x2556   : > { %v2129_v61 = vadd.f32 %v2127_v59, %v5211_v16  ;;  %v2381_v59 = vld [vmem:[#allocation9 + $0x18] sm:$0xff] }
0x2558   : > { %4398 = vtanh.f32 %v2129_v61  ;;  %v3570_v63 = vmul.f32 -1.442695, %v2129_v61  ;;  %v2384_v61 = vld [vmem:[#allocation11 + $0x10] sm:$0xff] }
0x255a   : > { %4400 = vpow2.f32 %v3570_v63  ;;  %v4148_v63 = vpack.c.bf16 %v2381_v59, %v2380_v58 }
0x2562   : > { %v4399_v62 = vpop.eup %4398 }
0x2563   : > { %2142 = vrot.lane.b32.xlu0 %v4399_v62, %s4714_s13  ;;  %v2385_v62 = vld [vmem:[#allocation11 + $0x18] sm:$0xff] }
0x2564   : > { %v4401_v0 = vpop.eup %4400 }
0x2565   : > { %v2133_v3 = vadd.f32 1.0, %v4401_v0  ;;  %v5306_v0 = vpack.c.bf16 %v2385_v62, %v2384_v61 }
0x2567   : > { %4402 = vrcp.f32 %v2133_v3 }
0x2571   : > { %v4403_v4 = vpop.eup %4402 }
0x2572   : > { %v2140_v7 = vmul.f32 %v4403_v4, %v2138_v10 }
0x25d5   : > { %v2143_v5 = vpop.permute.xlu0 %2142 }
0x25d6   : > { %v2145_v6 = vmul.f32 %v4403_v4, %v2143_v5 }
0x25d8   : > { %2147 = vrot.lane.b32.xlu1 %v2145_v6, %s4715_s21 }
0x264a   : > { %v2148_v8 = vpop.permute.xlu1 %2147 }
0x264b   : > { %v2150_v9 = vadd.f32 %v2148_v8, %v2140_v7 }
0x264d   : > { %4404 = vtanh.f32 %v2150_v9  ;;  %v2245_v30 = vrot.slane %v2150_v9, 7  ;;  %v3575_v9 = vld [vmem:[%s5513_s29] ss:$0 sm:$0xff] }
0x2657   : > { %v4405_v14 = vpop.eup %4404 }
0x2658   : > { %2153 = vrot.lane.b32.xlu0 %v4405_v14, %s4714_s13 }
0x26ca   : > { %v2154_v11 = vpop.permute.xlu0 %2153 }
0x26cb   : > { %v2156_v12 = vmul.f32 %v4403_v4, %v2154_v11 }
0x26cd   : > { %v2158_v13 = vrot.slane %v2156_v12, 5  ;;  %v2375_v15 = vsel %vm1432_vm6, %v2374_v57, %v2156_v12 }
0x26cf   : > { %2159 = vrot.lane.b32.xlu1 %v2158_v13, %s4715_s21 }
0x2741   : > { %v2160_v17 = vpop.permute.xlu1 %2159 }
0x2742   : > { %3919 = vmatmul.mubr.msk.f32.vlgmr.msra.gmra.mrb[16].mxu0 %vm504_vm1, %v2160_v17 }
0x2743   : > { %3940 = vmatprep.mubr.msk.f32.mxu0 %vm4712_vm0, %v4713_v2 }
0x2815   : > { %v2229_v19 = vpop.f32.mrb[16].mxu0 }
0x2816   : > { %v2234_v20 = vrot.slane %v2229_v19, 2  ;;  %v3920_v21 = vpop.f32.mrb[17].mxu0 }
0x2818   : > { %v2236_v22 = vadd.f32 %v2234_v20, %v5211_v16 }
0x281a   : > { %4406 = vtanh.f32 %v2236_v22  ;;  %v3572_v24 = vmul.f32 -1.442695, %v2236_v22 }
0x281c   : > { %4408 = vpow2.f32 %v3572_v24 }
0x2824   : > { %v4407_v23 = vpop.eup %4406 }
0x2825   : > { %2249 = vrot.lane.b32.xlu0 %v4407_v23, %s4714_s13 }
0x2826   : > { %v4409_v25 = vpop.eup %4408 }
0x2827   : > { %v2240_v26 = vadd.f32 1.0, %v4409_v25 }
0x2829   : > { %4410 = vrcp.f32 %v2240_v26 }
0x2833   : > { %v4411_v27 = vpop.eup %4410 }
0x2834   : > { %v2247_v31 = vmul.f32 %v4411_v27, %v2245_v30 }
0x2897   : > { %v2250_v28 = vpop.permute.xlu0 %2249 }
0x2898   : > { %v2252_v29 = vmul.f32 %v4411_v27, %v2250_v28 }
0x289a   : > { %2254 = vrot.lane.b32.xlu1 %v2252_v29, %s4715_s21 }
0x290c   : > { %v2255_v32 = vpop.permute.xlu1 %2254 }
0x290d   : > { %v2257_v33 = vadd.f32 %v2255_v32, %v2247_v31 }
0x290f   : > { %4412 = vtanh.f32 %v2257_v33  ;;  %v2352_v51 = vrot.slane %v2257_v33, 7 }
0x2919   : > { %v4413_v34 = vpop.eup %4412 }
0x291a   : > { %2260 = vrot.lane.b32.xlu0 %v4413_v34, %s4714_s13 }
0x298c   : > { %v2261_v35 = vpop.permute.xlu0 %2260 }
0x298d   : > { %v2263_v36 = vmul.f32 %v4411_v27, %v2261_v35 }
0x298f   : > { %v2265_v37 = vrot.slane %v2263_v36, 6  ;;  %v2376_v38 = vsel %vm1434_vm7, %v2375_v15, %v2263_v36 }
0x2991   : > { %2266 = vrot.lane.b32.xlu1 %v2265_v37, %s4715_s21 }
0x2a03   : > { %v2267_v39 = vpop.permute.xlu1 %2266 }
0x2a04   : > { %3930 = vmatmul.mubr.msk.f32.vlgmr.msra.gmra.mrb[16].mxu1 %vm504_vm1, %v2267_v39 }
0x2a05   : > { %3951 = vmatprep.mubr.msk.f32.mxu1 %vm4712_vm0, %v4713_v2  ;;  %4152 = vmatpush3.bf16.msra.mxu1 %v5302_v60 }
0x2a06   : > { %4153 = vmatprep.subr.bf16.mxu1 %v4711_v1 }
0x2a09   : > { %4155 = vmatpush3.bf16.msra.mxu1 %v5306_v0 }
0x2a0a   : > { %4162 = vmatprep.subr.bf16.mxu1 %v4711_v1 }
0x2a0c   : > { %3952 = vmatmul.mubr.f32.vlgmr.msra.gmra.mrb[18].mxu1 %v4713_v2 }
0x2a0d   : > { %4164 = vmatpush3.bf16.msra.mxu1 %v5302_v60  ;;  %3973 = vmatprep.mubr.msk.f32.mxu1 %vm4712_vm0, %v4713_v2 }
0x2a0e   : > { %4165 = vmatprep.subr.bf16.mxu1 %v4711_v1 }
0x2a11   : > { %4167 = vmatpush3.bf16.msra.mxu1 %v5306_v0 }
0x2a12   : > { %4174 = vmatprep.subr.bf16.mxu1 %v4711_v1 }
0x2ad7   : > { %v2336_v40 = vpop.f32.mrb[16].mxu1 }
0x2ad8   : > { %v2341_v41 = vrot.slane %v2336_v40, 1  ;;  %v3931_v42 = vpop.f32.mrb[17].mxu1 }
0x2ada   : > { %v2343_v43 = vadd.f32 %v2341_v41, %v5211_v16  ;;  %v2378_v16 = vld [vmem:[#allocation9] sm:$0xff] }
0x2adb   : > { %v4145_v57 = vpack.c.bf16 %v2379_v55, %v2378_v16 }
0x2adc   : > { %4414 = vtanh.f32 %v2343_v43  ;;  %v3574_v45 = vmul.f32 -1.442695, %v2343_v43 }
0x2add   : > { %4146 = vmatpush3.bf16.msra.mxu0 %v4145_v57 }
0x2ade   : > { %4416 = vpow2.f32 %v3574_v45  ;;  %4147 = vmatprep.subr.bf16.mxu0 %v4711_v1 }
0x2adf   : > { %v2534_v7 = vpop.f32.mrb[18].mxu1 }
0x2ae0   : > { %v3953_v8 = vpop.f32.mrb[19].mxu1 }
0x2ae1   : > { %4149 = vmatpush3.bf16.msra.mxu0 %v4148_v63 }
0x2ae2   : > { %4156 = vmatprep.subr.bf16.mxu0 %v4711_v1 }
0x2ae6   : > { %v4415_v44 = vpop.eup %4414 }
0x2ae7   : > { %2356 = vrot.lane.b32.xlu0 %v4415_v44, %s4714_s13 }
0x2ae8   : > { %v4417_v46 = vpop.eup %4416 }
0x2ae9   : > { %v2347_v47 = vadd.f32 1.0, %v4417_v46 }
0x2aeb   : > { %4418 = vrcp.f32 %v2347_v47 }
0x2af5   : > { %v4419_v48 = vpop.eup %4418 }
0x2af6   : > { %v2354_v52 = vmul.f32 %v4419_v48, %v2352_v51 }
0x2b59   : > { %v2357_v49 = vpop.permute.xlu0 %2356 }
0x2b5a   : > { %v2359_v50 = vmul.f32 %v4419_v48, %v2357_v49 }
0x2b5c   : > { %2361 = vrot.lane.b32.xlu1 %v2359_v50, %s4715_s21 }
0x2bce   : > { %v2362_v53 = vpop.permute.xlu1 %2361 }
0x2bcf   : > { %v2364_v54 = vadd.f32 %v2362_v53, %v2354_v52 }
0x2bd1   : > { %4420 = vtanh.f32 %v2364_v54 }
0x2bdb   : > { %v4421_v3 = vpop.eup %4420 }
0x2bdc   : > { %2367 = vrot.lane.b32.xlu0 %v4421_v3, %s4714_s13 }
0x2c4e   : > { %v2368_v4 = vpop.permute.xlu0 %2367 }
0x2c4f   : > { %v2370_v5 = vmul.f32 %v4419_v48, %v2368_v4 }
0x2c51   : > { %v2377_v6 = vsel %vm1436_vm8, %v2376_v38, %v2370_v5 }
0x2c52   : > { %2394 = vrot.lane.b32.xlu1 %v2377_v6, %s4715_s21 }
0x2cc4   : > { %v2395_v10 = vpop.permute.xlu1 %2394 }
0x2cc5   : > { %3941 = vmatmul.mubr.msk.f32.vlgmr.msra.gmra.mrb[18].mxu0 %vm504_vm1, %v2395_v10 }
0x2cc6   : > { %4158 = vmatpush3.bf16.msra.mxu0 %v5302_v60  ;;  %3962 = vmatprep.mubr.msk.f32.mxu0 %vm4712_vm0, %v4713_v2 }
0x2cc7   : > { %4159 = vmatprep.subr.bf16.mxu0 %v4711_v1 }
0x2cca   : > { %4161 = vmatpush3.bf16.msra.mxu0 %v5306_v0 }
0x2ccb   : > { %4168 = vmatprep.subr.bf16.mxu0 %v4711_v1 }
0x2d98   : > { %v2464_v14 = vpop.f32.mrb[18].mxu0 }
0x2d99   : > { %v5332_v11 = vadd.f32 %v3575_v9, %v2464_v14  ;;  %v3942_v12 = vpop.f32.mrb[19].mxu0 }
0x2d9b   : > { %v2538_v13 = vadd.f32 %v2534_v7, %v5332_v11 }
0x2d9d   : > { %4422 = vtanh.f32 %v2538_v13  ;;  %v3577_v17 = vmul.f32 -1.442695, %v2538_v13 }
0x2d9f   : > { %4424 = vpow2.f32 %v3577_v17 }
0x2da7   : > { %v4423_v15 = vpop.eup %4422 }
0x2da8   : > { %2548 = vrot.lane.b32.xlu0 %v4423_v15, %s4714_s13 }
0x2da9   : > { %v4425_v19 = vpop.eup %4424 }
0x2daa   : > { %v2542_v20 = vadd.f32 1.0, %v4425_v19 }
0x2dac   : > { %4426 = vrcp.f32 %v2542_v20 }
0x2db6   : > { %v4427_v21 = vpop.eup %4426 }
0x2db7   : > { %v2546_v24 = vmul.f32 0.0, %v4427_v21 }
0x2e1a   : > { %v2549_v22 = vpop.permute.xlu0 %2548 }
0x2e1b   : > { %v2551_v23 = vmul.f32 %v4427_v21, %v2549_v22 }
0x2e1d   : > { %2553 = vrot.lane.b32.xlu1 %v2551_v23, %s4715_s21 }
0x2e8f   : > { %v2554_v25 = vpop.permute.xlu1 %2553 }
0x2e90   : > { %v2556_v26 = vadd.f32 %v2554_v25, %v2546_v24 }
0x2e92   : > { %4428 = vtanh.f32 %v2556_v26  ;;  %v2650_v42 = vrot.slane %v2556_v26, 7 }
0x2e9c   : > { %v4429_v27 = vpop.eup %4428 }
0x2e9d   : > { %2559 = vrot.lane.b32.xlu0 %v4429_v27, %s4714_s13 }
0x2f0f   : > { %v2560_v28 = vpop.permute.xlu0 %2559 }
0x2f10   : > { %v5338_v29 = vmul.f32 %v4427_v21, %v2560_v28 }
0x2f12   : > { %2564 = vrot.lane.b32.xlu1 %v5338_v29, %s4715_s21 }
0x2f84   : > { %v2565_v30 = vpop.permute.xlu1 %2564 }
0x2f85   : > { %3963 = vmatmul.mubr.msk.f32.vlgmr.msra.gmra.mrb[20].mxu0 %vm504_vm1, %v2565_v30 }
0x2f86   : > { %4170 = vmatpush3.bf16.msra.mxu0 %v5302_v60  ;;  %3984 = vmatprep.mubr.msk.f32.mxu0 %vm4712_vm0, %v4713_v2 }
0x2f87   : > { %4171 = vmatprep.subr.bf16.mxu0 %v4711_v1 }
0x2f8a   : > { %4173 = vmatpush3.bf16.msra.mxu0 %v5306_v0 }
0x2f8b   : > { %4180 = vmatprep.subr.bf16.mxu0 %v4711_v1 }
0x3058   : > { %v2634_v31 = vpop.f32.mrb[20].mxu0 }
0x3059   : > { %v2639_v32 = vrot.slane %v2634_v31, 7  ;;  %v3964_v33 = vpop.f32.mrb[21].mxu0 }
0x305b   : > { %v2641_v34 = vadd.f32 %v2639_v32, %v5332_v11 }
0x305d   : > { %4430 = vtanh.f32 %v2641_v34  ;;  %v3579_v36 = vmul.f32 -1.442695, %v2641_v34 }
0x305f   : > { %4432 = vpow2.f32 %v3579_v36 }
0x3067   : > { %v4431_v35 = vpop.eup %4430 }
0x3068   : > { %2654 = vrot.lane.b32.xlu0 %v4431_v35, %s4714_s13 }
0x3069   : > { %v4433_v37 = vpop.eup %4432 }
0x306a   : > { %v2645_v38 = vadd.f32 1.0, %v4433_v37 }
0x306c   : > { %4434 = vrcp.f32 %v2645_v38 }
0x3076   : > { %v4435_v39 = vpop.eup %4434 }
0x3077   : > { %v2652_v43 = vmul.f32 %v4435_v39, %v2650_v42 }
0x30da   : > { %v2655_v40 = vpop.permute.xlu0 %2654 }
0x30db   : > { %v2657_v41 = vmul.f32 %v4435_v39, %v2655_v40 }
0x30dd   : > { %2659 = vrot.lane.b32.xlu1 %v2657_v41, %s4715_s21 }
0x314f   : > { %v2660_v44 = vpop.permute.xlu1 %2659 }
0x3150   : > { %v2662_v45 = vadd.f32 %v2660_v44, %v2652_v43 }
0x3152   : > { %4436 = vtanh.f32 %v2662_v45  ;;  %v2757_v61 = vrot.slane %v2662_v45, 7 }
0x315c   : > { %v4437_v46 = vpop.eup %4436 }
0x315d   : > { %2665 = vrot.lane.b32.xlu0 %v4437_v46, %s4714_s13 }
0x31cf   : > { %v2666_v47 = vpop.permute.xlu0 %2665 }
0x31d0   : > { %v2668_v48 = vmul.f32 %v4435_v39, %v2666_v47 }
0x31d2   : > { %v2670_v49 = vrot.slane %v2668_v48, 1  ;;  %v3311_v10 = vsel %vm1424_vm2, %v5338_v29, %v2668_v48 }
0x31d4   : > { %2671 = vrot.lane.b32.xlu1 %v2670_v49, %s4715_s21 }
0x3246   : > { %v2672_v50 = vpop.permute.xlu1 %2671 }
0x3247   : > { %3974 = vmatmul.mubr.msk.f32.vlgmr.msra.gmra.mrb[20].mxu1 %vm504_vm1, %v2672_v50 }
0x3248   : > { %4176 = vmatpush3.bf16.msra.mxu1 %v5302_v60  ;;  %3995 = vmatprep.mubr.msk.f32.mxu1 %vm4712_vm0, %v4713_v2 }
0x3249   : > { %4177 = vmatprep.subr.bf16.mxu1 %v4711_v1 }
0x324c   : > { %4179 = vmatpush3.bf16.msra.mxu1 %v5306_v0 }
0x324d   : > { %4186 = vmatprep.subr.bf16.mxu1 %v4711_v1 }
0x331a   : > { %v2741_v51 = vpop.f32.mrb[20].mxu1 }
0x331b   : > { %v2746_v52 = vrot.slane %v2741_v51, 6  ;;  %v3975_v53 = vpop.f32.mrb[21].mxu1 }
0x331d   : > { %v2748_v54 = vadd.f32 %v2746_v52, %v5332_v11 }
0x331f   : > { %4438 = vtanh.f32 %v2748_v54  ;;  %v3581_v55 = vmul.f32 -1.442695, %v2748_v54 }
0x3321   : > { %4440 = vpow2.f32 %v3581_v55 }
0x3329   : > { %v4439_v16 = vpop.eup %4438 }
0x332a   : > { %2761 = vrot.lane.b32.xlu0 %v4439_v16, %s4714_s13 }
0x332b   : > { %v4441_v56 = vpop.eup %4440 }
0x332c   : > { %v2752_v57 = vadd.f32 1.0, %v4441_v56 }
0x332e   : > { %4442 = vrcp.f32 %v2752_v57 }
0x3338   : > { %v4443_v18 = vpop.eup %4442 }
0x3339   : > { %v2759_v62 = vmul.f32 %v4443_v18, %v2757_v61 }
0x339c   : > { %v2762_v58 = vpop.permute.xlu0 %2761 }
0x339d   : > { %v2764_v59 = vmul.f32 %v4443_v18, %v2762_v58 }
0x339f   : > { %2766 = vrot.lane.b32.xlu1 %v2764_v59, %s4715_s21 }
0x3411   : > { %v2767_v63 = vpop.permute.xlu1 %2766 }
0x3412   : > { %v2769_v3 = vadd.f32 %v2767_v63, %v2759_v62 }
0x3414   : > { %4444 = vtanh.f32 %v2769_v3  ;;  %v2864_v25 = vrot.slane %v2769_v3, 7 }
0x341e   : > { %v4445_v4 = vpop.eup %4444 }
0x341f   : > { %2772 = vrot.lane.b32.xlu0 %v4445_v4, %s4714_s13 }
0x3491   : > { %v2773_v5 = vpop.permute.xlu0 %2772 }
0x3492   : > { %v2775_v6 = vmul.f32 %v4443_v18, %v2773_v5 }
0x3494   : > { %v2777_v7 = vrot.slane %v2775_v6, 2  ;;  %v3312_v8 = vsel %vm1426_vm3, %v3311_v10, %v2775_v6 }
0x3496   : > { %2778 = vrot.lane.b32.xlu1 %v2777_v7, %s4715_s21 }
0x3508   : > { %v2779_v9 = vpop.permute.xlu1 %2778 }
0x3509   : > { %3985 = vmatmul.mubr.msk.f32.vlgmr.msra.gmra.mrb[22].mxu0 %vm504_vm1, %v2779_v9 }
0x350a   : > { %4182 = vmatpush3.bf16.msra.mxu0 %v5302_v60  ;;  %4006 = vmatprep.mubr.msk.f32.mxu0 %vm4712_vm0, %v4713_v2 }
0x350b   : > { %4183 = vmatprep.subr.bf16.mxu0 %v4711_v1 }
0x350e   : > { %4185 = vmatpush3.bf16.msra.mxu0 %v5306_v0 }
0x350f   : > { %4192 = vmatprep.subr.bf16.mxu0 %v4711_v1 }
0x35dc   : > { %v2848_v14 = vpop.f32.mrb[22].mxu0 }
0x35dd   : > { %v2853_v12 = vrot.slane %v2848_v14, 5  ;;  %v3986_v13 = vpop.f32.mrb[23].mxu0 }
0x35df   : > { %v2855_v15 = vadd.f32 %v2853_v12, %v5332_v11 }
0x35e1   : > { %4446 = vtanh.f32 %v2855_v15  ;;  %v3583_v19 = vmul.f32 -1.442695, %v2855_v15 }
0x35e3   : > { %4448 = vpow2.f32 %v3583_v19 }
0x35eb   : > { %v4447_v17 = vpop.eup %4446 }
0x35ec   : > { %2868 = vrot.lane.b32.xlu0 %v4447_v17, %s4714_s13 }
0x35ed   : > { %v4449_v20 = vpop.eup %4448 }
0x35ee   : > { %v2859_v21 = vadd.f32 1.0, %v4449_v20 }
0x35f0   : > { %4450 = vrcp.f32 %v2859_v21 }
0x35fa   : > { %v4451_v22 = vpop.eup %4450 }
0x35fb   : > { %v2866_v26 = vmul.f32 %v4451_v22, %v2864_v25 }
0x365e   : > { %v2869_v23 = vpop.permute.xlu0 %2868 }
0x365f   : > { %v2871_v24 = vmul.f32 %v4451_v22, %v2869_v23 }
0x3661   : > { %2873 = vrot.lane.b32.xlu1 %v2871_v24, %s4715_s21 }
0x36d3   : > { %v2874_v27 = vpop.permute.xlu1 %2873 }
0x36d4   : > { %v2876_v28 = vadd.f32 %v2874_v27, %v2866_v26 }
0x36d6   : > { %4452 = vtanh.f32 %v2876_v28  ;;  %v2971_v46 = vrot.slane %v2876_v28, 7 }
0x36e0   : > { %v4453_v29 = vpop.eup %4452 }
0x36e1   : > { %2879 = vrot.lane.b32.xlu0 %v4453_v29, %s4714_s13 }
0x3753   : > { %v2880_v30 = vpop.permute.xlu0 %2879 }
0x3754   : > { %v2882_v31 = vmul.f32 %v4451_v22, %v2880_v30 }
0x3756   : > { %v2884_v32 = vrot.slane %v2882_v31, 3  ;;  %v3313_v33 = vsel %vm1428_vm4, %v3312_v8, %v2882_v31 }
0x3758   : > { %2885 = vrot.lane.b32.xlu1 %v2884_v32, %s4715_s21 }
0x37ca   : > { %v2886_v34 = vpop.permute.xlu1 %2885 }
0x37cb   : > { %3996 = vmatmul.mubr.msk.f32.vlgmr.msra.gmra.mrb[22].mxu1 %vm504_vm1, %v2886_v34 }
0x37cc   : > { %4188 = vmatpush3.bf16.msra.mxu1 %v5302_v60  ;;  %4017 = vmatprep.mubr.msk.f32.mxu1 %vm4712_vm0, %v4713_v2 }
0x37cd   : > { %4189 = vmatprep.subr.bf16.mxu1 %v4711_v1 }
0x37d0   : > { %4191 = vmatpush3.bf16.msra.mxu1 %v5306_v0 }
0x37d1   : > { %4031 = vmatprep.subr.mxu1 %v4713_v2 }
0x389e   : > { %v2955_v35 = vpop.f32.mrb[22].mxu1 }
0x389f   : > { %v2960_v36 = vrot.slane %v2955_v35, 4  ;;  %v3997_v37 = vpop.f32.mrb[23].mxu1 }
0x38a1   : > { %v2962_v38 = vadd.f32 %v2960_v36, %v5332_v11 }
0x38a3   : > { %4454 = vtanh.f32 %v2962_v38  ;;  %v3585_v40 = vmul.f32 -1.442695, %v2962_v38 }
0x38a5   : > { %4456 = vpow2.f32 %v3585_v40 }
0x38ad   : > { %v4455_v39 = vpop.eup %4454 }
0x38ae   : > { %2975 = vrot.lane.b32.xlu0 %v4455_v39, %s4714_s13 }
0x38af   : > { %v4457_v41 = vpop.eup %4456 }
0x38b0   : > { %v2966_v42 = vadd.f32 1.0, %v4457_v41 }
0x38b2   : > { %4458 = vrcp.f32 %v2966_v42 }
0x38bc   : > { %v4459_v43 = vpop.eup %4458 }
0x38bd   : > { %v2973_v47 = vmul.f32 %v4459_v43, %v2971_v46 }
0x3920   : > { %v2976_v44 = vpop.permute.xlu0 %2975 }
0x3921   : > { %v2978_v45 = vmul.f32 %v4459_v43, %v2976_v44 }
0x3923   : > { %2980 = vrot.lane.b32.xlu1 %v2978_v45, %s4715_s21 }
0x3995   : > { %v2981_v48 = vpop.permute.xlu1 %2980 }
0x3996   : > { %v2983_v49 = vadd.f32 %v2981_v48, %v2973_v47 }
0x3998   : > { %4460 = vtanh.f32 %v2983_v49 }
0x39a2   : > { %v4461_v50 = vpop.eup %4460 }
0x39a3   : > { %2986 = vrot.lane.b32.xlu0 %v4461_v50, %s4714_s13  ;;  %v3319_v50 = vld [vmem:[#allocation2] sm:$0x1] }
0x3a15   : > { %v2987_v51 = vpop.permute.xlu0 %2986 }
0x3a16   : > { %v2989_v52 = vmul.f32 %v4459_v43, %v2987_v51  ;;  %v4716_v51 = vmov 0  }
0x3a17   : > { %4293 = vset.pattern.permute.xlu0 %v4716_v51 }
0x3a18   : > { %v2991_v53 = vrot.slane %v2989_v52, 4  ;;  %v3314_v54 = vsel %vm1430_vm5, %v3313_v33, %v2989_v52 }
0x3a1a   : > { %2992 = vrot.lane.b32.xlu1 %v2991_v53, %s4715_s21 }
0x3a8c   : > { %v2993_v16 = vpop.permute.xlu1 %2992 }
0x3a8d   : > { %4007 = vmatmul.mubr.msk.f32.vlgmr.msra.gmra.mrb[24].mxu0 %vm504_vm1, %v2993_v16 }
0x3a8e   : > { %4194 = vmatpush3.bf16.msra.mxu0 %v5302_v60  ;;  %4028 = vmatprep.mubr.msk.f32.mxu0 %vm4712_vm0, %v4713_v2 }
0x3a8f   : > { %4195 = vmatprep.subr.bf16.mxu0 %v4711_v1  ;;  %v3078_v1 = vrot.slane %v2983_v49, 7 }
0x3a92   : > { %4197 = vmatpush3.bf16.msra.mxu0 %v5306_v0 }
0x3b60   : > { %v3062_v55 = vpop.f32.mrb[24].mxu0 }
0x3b61   : > { %v3067_v56 = vrot.slane %v3062_v55, 3  ;;  %v4008_v57 = vpop.f32.mrb[25].mxu0  ;;  %v3318_v55 = vld [vmem:[%s5514_s14] sm:$0x1] }
0x3b63   : > { %v3069_v18 = vadd.f32 %v3067_v56, %v5332_v11  ;;  %v3325_v56 = vlaneseq }
0x3b65   : > { %4462 = vtanh.f32 %v3069_v18  ;;  %v3587_v59 = vmul.f32 -1.442695, %v3069_v18  ;;  %v3326_v57 = vshrl.u32 %v3325_v56, 7 }
0x3b67   : > { %4464 = vpow2.f32 %v3587_v59  ;;  %v3327_v18 = vsub.s32 0, %v3326_v57 }
0x3b6f   : > { %v4463_v58 = vpop.eup %4462 }
0x3b70   : > { %3082 = vrot.lane.b32.xlu0 %v4463_v58, %s4714_s13 }
0x3b71   : > { %v4465_v61 = vpop.eup %4464 }
0x3b72   : > { %v3073_v60 = vadd.f32 1.0, %v4465_v61 }
0x3b74   : > { %4466 = vrcp.f32 %v3073_v60 }
0x3b7e   : > { %v4467_v62 = vpop.eup %4466 }
0x3b7f   : > { %v3080_v0 = vmul.f32 %v4467_v62, %v3078_v1 }
0x3be2   : > { %v3083_v63 = vpop.permute.xlu0 %3082 }
0x3be3   : > { %v3085_v3 = vmul.f32 %v4467_v62, %v3083_v63 }
0x3be5   : > { %3087 = vrot.lane.b32.xlu1 %v3085_v3, %s4715_s21 }
0x3c57   : > { %v3088_v4 = vpop.permute.xlu1 %3087 }
0x3c58   : > { %v3090_v5 = vadd.f32 %v3088_v4, %v3080_v0 }
0x3c5a   : > { %4468 = vtanh.f32 %v3090_v5 }
0x3c64   : > { %v4469_v6 = vpop.eup %4468 }
0x3c65   : > { %3093 = vrot.lane.b32.xlu0 %v4469_v6, %s4714_s13 }
0x3cd7   : > { %v3094_v10 = vpop.permute.xlu0 %3093 }
0x3cd8   : > { %v3096_v7 = vmul.f32 %v4467_v62, %v3094_v10 }
0x3cda   : > { %v3098_v8 = vrot.slane %v3096_v7, 5  ;;  %v3315_v9 = vsel %vm1432_vm6, %v3314_v54, %v3096_v7 }
0x3cdc   : > { %3099 = vrot.lane.b32.xlu1 %v3098_v8, %s4715_s21 }
0x3d4e   : > { %v3100_v14 = vpop.permute.xlu1 %3099 }
0x3d4f   : > { %4018 = vmatmul.mubr.msk.f32.vlgmr.msra.gmra.mrb[24].mxu1 %vm504_vm1, %v3100_v14 }
0x3d50   : > { %4033 = vmatprep.mubr.msk.f32.mxu1 %vm4712_vm0, %v4713_v2  ;;  %v3185_v2 = vrot.slane %v3090_v5, 7 }
0x3e22   : > { %v3169_v12 = vpop.f32.mrb[24].mxu1 }
0x3e23   : > { %v3174_v13 = vrot.slane %v3169_v12, 2  ;;  %v4019_v15 = vpop.f32.mrb[25].mxu1 }
0x3e25   : > { %v3176_v17 = vadd.f32 %v3174_v13, %v5332_v11 }
0x3e27   : > { %4470 = vtanh.f32 %v3176_v17  ;;  %v3589_v20 = vmul.f32 -1.442695, %v3176_v17 }
0x3e29   : > { %4472 = vpow2.f32 %v3589_v20 }
0x3e31   : > { %v4471_v19 = vpop.eup %4470 }
0x3e32   : > { %3189 = vrot.lane.b32.xlu0 %v4471_v19, %s4714_s13 }
0x3e33   : > { %v4473_v21 = vpop.eup %4472 }
0x3e34   : > { %v3180_v22 = vadd.f32 1.0, %v4473_v21 }
0x3e36   : > { %4474 = vrcp.f32 %v3180_v22 }
0x3e40   : > { %v4475_v23 = vpop.eup %4474 }
0x3e41   : > { %v3187_v26 = vmul.f32 %v4475_v23, %v3185_v2 }
0x3ea4   : > { %v3190_v24 = vpop.permute.xlu0 %3189 }
0x3ea5   : > { %v3192_v25 = vmul.f32 %v4475_v23, %v3190_v24 }
0x3ea7   : > { %3194 = vrot.lane.b32.xlu1 %v3192_v25, %s4715_s21 }
0x3f19   : > { %v3195_v27 = vpop.permute.xlu1 %3194 }
0x3f1a   : > { %v3197_v28 = vadd.f32 %v3195_v27, %v3187_v26 }
0x3f1c   : > { %4476 = vtanh.f32 %v3197_v28  ;;  %v3292_v46 = vrot.slane %v3197_v28, 7 }
0x3f26   : > { %v4477_v29 = vpop.eup %4476 }
0x3f27   : > { %3200 = vrot.lane.b32.xlu0 %v4477_v29, %s4714_s13 }
0x3f99   : > { %v3201_v30 = vpop.permute.xlu0 %3200 }
0x3f9a   : > { %v3203_v31 = vmul.f32 %v4475_v23, %v3201_v30 }
0x3f9c   : > { %v3205_v32 = vrot.slane %v3203_v31, 6  ;;  %v3316_v33 = vsel %vm1434_vm7, %v3315_v9, %v3203_v31 }
0x3f9e   : > { %3206 = vrot.lane.b32.xlu1 %v3205_v32, %s4715_s21 }
0x4010   : > { %v3207_v34 = vpop.permute.xlu1 %3206 }
0x4011   : > { %4029 = vmatmul.mubr.msk.f32.vlgmr.msra.gmra.mrb[26].mxu0 %vm504_vm1, %v3207_v34 }
0x40e4   : > { %v3276_v35 = vpop.f32.mrb[26].mxu0 }
0x40e5   : > { %v3281_v36 = vrot.slane %v3276_v35, 1  ;;  %v4030_v37 = vpop.f32.mrb[27].mxu0 }
0x40e7   : > { %v3283_v38 = vadd.f32 %v3281_v36, %v5332_v11 }
0x40e9   : > { %4478 = vtanh.f32 %v3283_v38  ;;  %v3591_v40 = vmul.f32 -1.442695, %v3283_v38 }
0x40eb   : > { %4480 = vpow2.f32 %v3591_v40 }
0x40f3   : > { %v4479_v39 = vpop.eup %4478 }
0x40f4   : > { %3296 = vrot.lane.b32.xlu0 %v4479_v39, %s4714_s13 }
0x40f5   : > { %v4481_v41 = vpop.eup %4480 }
0x40f6   : > { %v3287_v42 = vadd.f32 1.0, %v4481_v41 }
0x40f8   : > { %4482 = vrcp.f32 %v3287_v42 }
0x4102   : > { %v4483_v43 = vpop.eup %4482 }
0x4103   : > { %v3294_v47 = vmul.f32 %v4483_v43, %v3292_v46 }
0x4166   : > { %v3297_v44 = vpop.permute.xlu0 %3296 }
0x4167   : > { %v3299_v45 = vmul.f32 %v4483_v43, %v3297_v44 }
0x4169   : > { %3301 = vrot.lane.b32.xlu1 %v3299_v45, %s4715_s21 }
0x41db   : > { %v3302_v48 = vpop.permute.xlu1 %3301 }
0x41dc   : > { %v3304_v49 = vadd.f32 %v3302_v48, %v3294_v47 }
0x41de   : > { %4484 = vtanh.f32 %v3304_v49 }
0x41e8   : > { %v4485_v11 = vpop.eup %4484 }
0x41e9   : > { %3307 = vrot.lane.b32.xlu0 %v4485_v11, %s4714_s13  ;;  %s3594_s13 = sshll.u32 %s4807_s28, 4  ;;  %s4717_s28 = smov [#allocation12]  }
0x41ea   : > { %s5433_s30 = scalar_lea.hbm %s5515_s9, %s3594_s13  ;;  %s4632_s29 = sshll.u32 %s4717_s28, 4  ;;  %s4633_s29 = int_to_ptr.vmem [resolvable:$false] %s4632_s29 }
0x41eb   : > { %s4634_s17 = scalar_lea.vmem %s4633_s29, 32  ;;  %p4635_p12 = scmp.lt.s32.totalorder %s5435_s19, %s4633_s29 }
0x41ec   : > { %p4636_p3 = scmp.lt.s32.totalorder %s4634_s17, %s4628_s16 }
0x41ed   : > { %3322 = vperm.xlu0 %4293, %v3319_v50  }
0x41ee   : > { %p4637_p13 = por %p4636_p3, %p4635_p12 }
0x41f0   : > { %p4638_p0 = pnand %p4637_p13, %p4631_p9 }
0x425b   : > { %v3308_v52 = vpop.permute.xlu0 %3307 }
0x425c   : > { %v3310_v53 = vmul.f32 %v4483_v43, %v3308_v52 }
0x425e   : > { %v3317_v54 = vsel %vm1436_vm8, %v3316_v33, %v3310_v53 }
0x425f   : > { %3330 = vrot.lane.b32.xlu1 %v3317_v54, %s4715_s21 }
0x426c   : > { %v3323_v58 = vpop.permute.xlu0 %3322 }
0x426d   : > { %v3328_v59 = vrot.slane %v3323_v58, %v3327_v18 }
0x42d1   : > { %v3331_v16 = vpop.permute.xlu1 %3330 }
0x42d2   : > { %4032 = vmatpush3.xpose.msk.msra.mxu1 %vm504_vm1, %v3331_v16 }
0x42d5   : > { %4034 = vmatmul.mubr.msk.f32.vlgmr.msra.gmra.mrb[26].mxu1 %vm504_vm1, %v3318_v55 }
0x43a8   : > { %v3403_v61 = vpop.f32.mrb[26].mxu1 }
0x43a9   : > { %v3404_v60 = vadd.f32 %v3403_v61, %v3328_v59  ;;  %v4035_v62 = vpop.f32.mrb[27].mxu1 }
0x43ab   : > { %3408 = vst.msk [vmem:[%s487_s10] sm:$0x1] %vm3407_vm9, %v3404_v60 }
0x43ac   : > { %4641 = shalt.err (!%p4638_p0)
}
0x43ad   : > { %s4642_s2 = scalar_lea.hbm %s5433_s30, 16  ;;  %s4646_s13 = scalar_lea.hbm %s5515_s9, 32 }
0x43ae   : > { %p4643_p2 = scmp.ne.s32.totalorder %s5433_s30, %s4642_s2  ;;  %p4647_p10 = scmp.lt.u32.totalorder %s5433_s30, %s5515_s9 }
0x43af   : > { %p4648_p11 = scmp.lt.u32.totalorder %s4646_s13, %s4642_s2  ;;  %p4650_p6 = scmp.lt.u32.totalorder %s4642_s2, %s5433_s30 }
0x43b0   : > { %p4644_p8 = pnand %p4643_p2, %p5516_p5 }
0x43b1   : > { %p4649_p1 = por %p4648_p11, %p4647_p10 }
0x43b2   : > { %p4645_p4 = pneg %p4644_p8 }
0x43b3   : > { %p4651_p7 = por %p4650_p6, %p4649_p1 }
0x43b5   : > { %p4652_p9 = pnand %p4651_p7, %p4645_p4 }
0x43b7   : > { %4655 = shalt.err (!%p4652_p9)
}
0x43b8   : > { %4216 = dma.vmem_to_hbm [thread:$0]  (%p5516_p5), %s5435_s19, 16, %s5433_s30, %s3410_s15  }
0x43b9 PF: > { %s3434_s18 = sand.u32 1, %s4690_s23   ;;  %p5517_p12 = scmp.ne.s32.totalorder %s5506_s11, 0 }
0x43ba   : > { %p5518_p3 = scmp.ge.s32.totalorder %s4702_s26, 2  ;;  %s3435_s16 = scalar_lea.sflag [#allocation5], %s3434_s18 }
0x43bc   : > { %p4236_p13 = pnand %p5518_p3, %p5517_p12 }
0x43be   : > { %4685 = dma.done.wait (!%p4236_p13), %s3435_s16, 16  }
0x43bf   : > { %4687 = vsyncadd (!%p4236_p13), %s3435_s16, 4294967280  ;;  %p29_p0 = scmp.ge.s32.totalorder %s4938_s22, 4   ;;  %s5519_s23 = smov %s4694_s24 }
0x43c0   : > { %s5520_s24 = smov %s4698_s25  ;;  %s5521_s25 = smov %s4949_s20 }
0x43c1   : > { %s5522_s26 = smov %s4938_s22  ;;  %31 = sbr.rel (!%p29_p0) target bundleno = 12 (0xc), region = 129 }
0x43c8   :  { %3439 = vsyncpa [#allocation4], 1 }
0x43c9   :  { %3441 = vsyncpa [#allocation4 + $0x1], 1 }
0x43ca   :  { %3442 = vsyncpa [#allocation7], 1 }
0x43cb   :  { %3443 = vsyncpa [#allocation10], 1 }
0x43cc   :  { %3444 = vsyncpa [#allocation5], 1 }
0x43cd   :  { %3446 = vsyncpa [#allocation5 + $0x1], 1 }

</bundles_post_ra>
